<compile_context>
chip_gen: v7x
topology: tpu7x:2x2x1
jax: 0.10.0
libtpu: 0.0.40
codegen_flags: <defaults>
</compile_context>

<pallas_src>
import functools

import jax
import jax.numpy as jnp
from jax.experimental import pallas as pl
from jax.experimental.pallas import tpu as pltpu


def _layer_norm(x, g, b, eps=1e-8):
    mu = jnp.mean(x, axis=-1, keepdims=True)
    xc = x - mu
    var = jnp.mean(xc * xc, axis=-1, keepdims=True)
    return xc * jax.lax.rsqrt(var + eps) * g + b


def bert_backbone_kernel(
    seqs_ref, keep_ref,
    ln1_g_ref, ln1_b_ref,
    wqkv_ref, bqkv_ref, wo_ref, bo_ref,
    ln2_g_ref, ln2_b_ref,
    w1_ref, b1_ref, w2_ref, b2_ref,
    lng_ref, lnb_ref,
    out_ref,
    x_ref,        # VMEM scratch (Bb*S, H) f32: residual stream carried across layers
    attn_ref,     # VMEM scratch (Bb*S, H) compute dtype: concatenated head outputs
    *, num_heads):
    l = pl.program_id(1)
    num_l = pl.num_programs(1)

    Bb, S, H = seqs_ref.shape
    hd = H // num_heads
    cdt = wqkv_ref.dtype        # MXU operand dtype (bf16 production / f32 validation)

    keep = keep_ref[...].reshape(Bb * S, 1)          # f32 {0,1}

    # Initialize the carried residual stream at the first layer of this block.
    @pl.when(l == 0)
    def _():
        x_ref[...] = seqs_ref[...].reshape(Bb * S, H) * keep

    x = x_ref[...]                                   # (Bb*S, H) f32

    w_qkv = wqkv_ref[0]          # (H, 3H), compute dtype; Q columns pre-scaled
    b_qkv = bqkv_ref[0]          # (1, 3H), f32;           Q bias pre-scaled

    # Q from attention-LayerNorm(x); K, V from the raw residual stream
    # (mirrors the reference: Q = LN(seqs); mha(Q, seqs, seqs)).
    q_in = _layer_norm(x, ln1_g_ref[0], ln1_b_ref[0])                 # f32
    q = jnp.dot(q_in.astype(cdt), w_qkv[:, :H],
                preferred_element_type=jnp.float32) + b_qkv[:, :H]
    # Fused K/V projection: one wide (M,H)x(H,2H) MXU op.
    kv = jnp.dot(x.astype(cdt), w_qkv[:, H:],
                 preferred_element_type=jnp.float32) + b_qkv[:, H:]

    # (#5) Cast to compute dtype ONCE (full-vreg casts), then slice.
    q_c = q.astype(cdt).reshape(Bb, S, H)
    kv_c = kv.astype(cdt)
    k_c = kv_c[:, :H].reshape(Bb, S, H)
    v_c = kv_c[:, H:].reshape(Bb, S, H)

    # (#6) Head-batched attention: gather per-head lane slices onto a leading
    # batch axis -> (nh*Bb, S, hd); single batched einsum for scores and for PV
    # (no per-head Python-unrolled matmul / softmax code, bounded live ranges).
    def split_heads(t):  # (Bb, S, H) -> (nh*Bb, S, hd); head h at rows [h*Bb:(h+1)*Bb]
        return jnp.concatenate(
            [t[:, :, h * hd:(h + 1) * hd] for h in range(num_heads)], axis=0)

    qh = split_heads(q_c)
    kh = split_heads(k_c)
    vh = split_heads(v_c)

    s = jnp.einsum("bqd,bkd->bqk", qh, kh,
                   preferred_element_type=jnp.float32)                # (nh*Bb, S, S)
    s = s - jnp.max(s, axis=-1, keepdims=True)
    e = jnp.exp(s)
    denom = jnp.sum(e, axis=-1, keepdims=True)
    if cdt == jnp.float32:
        p = e / denom                                  # exact softmax for f32 validation
    else:
        p = e * pl.reciprocal(denom, approx=True)      # EUP slot on the production path
    o = jnp.einsum("bqk,bkd->bqd", p.astype(cdt), vh,
                   preferred_element_type=jnp.float32)                # (nh*Bb, S, hd)
    o_c = o.astype(cdt)

    # (#4) Scatter head outputs into a lane-contiguous (Bb*S, H) VMEM scratch,
    # then ONE full-depth (M,H)x(H,H) output projection (K=H fills the MXU,
    # instead of num_heads shallow K=hd dots).  The masked sub-lane stores are
    # store-slot work hidden under the MXU.
    for h in range(num_heads):
        attn_ref[:, h * hd:(h + 1) * hd] = o_c[h * Bb:(h + 1) * Bb].reshape(Bb * S, hd)
    attn = jnp.dot(attn_ref[...], wo_ref[0],
                   preferred_element_type=jnp.float32) + bo_ref[0]

    x = q_in + attn                  # residual on LayerNormed Q (reference quirk)
    x = _layer_norm(x, ln2_g_ref[0], ln2_b_ref[0])

    # PointWiseFeedForward: two 1x1 conv1d == two H->H linears + ReLU + residual.
    h1 = jnp.maximum(
        jnp.dot(x.astype(cdt), w1_ref[0],
                preferred_element_type=jnp.float32) + b1_ref[0], 0.0)
    h2 = jnp.dot(h1.astype(cdt), w2_ref[0],
                 preferred_element_type=jnp.float32) + b2_ref[0]
    x = (x + h2) * keep              # re-apply timeline mask
    x_ref[...] = x                   # carry to next layer

    @pl.when(l == num_l - 1)
    def _():
        out_ref[...] = _layer_norm(
            x, lng_ref[...], lnb_ref[...]).reshape(Bb, S, H).astype(out_ref.dtype)


def _tpu_budgets():
    """(#1/#2/#3) Generation-aware VMEM limit, M=Bb*S target, TensorCore count."""
    vmem_cap = 64 * 1024 * 1024      # conservative fallback (v7x has 64 MiB / TC)
    name = ""
    try:
        info = pltpu.get_tpu_info()
        vmem_cap = int(getattr(info, "vmem_capacity_bytes", vmem_cap)) or vmem_cap
        for attr in ("chip_version", "version", "generation"):
            v = getattr(info, attr, None)
            if v is not None:
                name = str(v).lower()
                break
    except Exception:
        pass
    # ~3/4 of physical VMEM: ~96 MiB on v5e/v6e (128 MiB), ~48 MiB on v7x (64 MiB).
    vmem_limit = (vmem_cap * 3) // 4
    # Weight-DMA break-even M is ~240 (v5e) / ~650 (v6e) / ~310 (v7x); target above it.
    m_target = 1024 if ("v6" in name or "6e" in name) else 512
    num_cores = 2 if ("v7" in name or "7x" in name) else 1
    return vmem_limit, m_target, num_cores


def _est_vmem_bytes(Bb, S, H, num_heads, compute_dtype, out_itemsize):
    """Rough per-step VMEM footprint used to cap Bb."""
    cds = jnp.dtype(compute_dtype).itemsize
    m = Bb * S
    weights = 2 * (6 * H * H * cds + 12 * H * 4)            # double-buffered layer weights
    io = 2 * (m * H * 4 + m * 4) + 2 * m * H * out_itemsize  # seqs/keep in, out
    scratch = m * H * (4 + cds)                              # x carry + attn scratch
    acts = 9 * m * H * 4 + 2 * num_heads * Bb * S * S * 4    # q/kv/casts/ffn + scores
    return weights + io + scratch + acts


def _pick_block_b(B, S, H, num_heads, compute_dtype, out_itemsize,
                  m_target, vmem_limit, num_cores):
    best = 1
    for cand in range(1, B + 1):
        if B % cand:
            continue
        g0 = B // cand
        # (#3) keep the "parallel" batch axis shardable across both v7x TCs.
        if g0 < num_cores or g0 % num_cores:
            continue
        if cand * S > m_target:
            continue
        if _est_vmem_bytes(cand, S, H, num_heads, compute_dtype,
                           out_itemsize) > int(0.85 * vmem_limit):
            continue
        best = cand
    return best


def bert_backbone(seqs, log_seqs, params, num_heads, *,
                  block_b=None, compute_dtype=jnp.bfloat16, out_dtype=None):
    B, S, H = seqs.shape
    L = params["ln1_g"].shape[0]
    assert H % num_heads == 0
    hd = H // num_heads
    out_dtype = seqs.dtype if out_dtype is None else out_dtype  # (#10) bf16 halves writes

    vmem_limit, m_target, num_cores = _tpu_budgets()

    if block_b is None:
        block_b = _pick_block_b(B, S, H, num_heads, compute_dtype,
                                jnp.dtype(out_dtype).itemsize,
                                m_target, vmem_limit, num_cores)
    Bb = block_b
    assert B % Bb == 0, "batch must be divisible by block_b"

    keep = (log_seqs != 0).astype(jnp.float32)[:, :, None]            # (B, S, 1)

    # One-time weight prep: fold 1/sqrt(hd) into the Q projection, cast MXU
    # operands to compute_dtype (biases / LN params stay f32).
    scale = 1.0 / float(hd) ** 0.5
    wqkv = params["wqkv_t"].at[:, :, :H].multiply(scale).astype(compute_dtype)
    bqkv = params["bqkv"].at[:, :, :H].multiply(scale).astype(jnp.float32)
    wo = params["wo_t"].astype(compute_dtype)
    w1 = params["w1_t"].astype(compute_dtype)
    w2 = params["w2_t"].astype(compute_dtype)

    per_layer = [
        params["ln1_g"], params["ln1_b"],
        wqkv, bqkv, wo, params["bo"],
        params["ln2_g"], params["ln2_b"],
        w1, params["b1"], w2, params["b2"],
    ]
    last = [params["last_g"], params["last_b"]]

    def layer_spec(a):  # per-layer weight: block (1, ...) indexed by layer axis
        zeros = (0,) * (a.ndim - 1)
        # (#9) if weight DMA is still exposed at large Bb, add
        # pipeline_mode=pl.Buffered(3) here for wqkv/wo/w1/w2 only.
        return pl.BlockSpec((1,) + a.shape[1:],
                            lambda b, l, zeros=zeros: (l,) + zeros)

    def rep_spec(a):    # replicated (final LayerNorm params)
        zeros = (0,) * a.ndim
        return pl.BlockSpec(a.shape, lambda b, l, zeros=zeros: zeros)

    in_specs = [
        pl.BlockSpec((Bb, S, H), lambda b, l: (b, 0, 0)),   # seqs
        pl.BlockSpec((Bb, S, 1), lambda b, l: (b, 0, 0)),   # keep mask
    ] + [layer_spec(a) for a in per_layer] + [rep_spec(a) for a in last]

    kernel = functools.partial(bert_backbone_kernel, num_heads=num_heads)

    # Advisory cost estimate for XLA's scheduler.
    flops = int(2 * B * L * (6 * S * H * H + 2 * S * S * H))
    transcendentals = int(B * L * num_heads * S * S + B * S * (2 * L + 1))
    wbytes = (B // Bb) * L * 6 * H * H * jnp.dtype(compute_dtype).itemsize
    abytes = B * S * H * (4 + jnp.dtype(out_dtype).itemsize) + B * S * 4
    cost = pl.CostEstimate(flops=flops, transcendentals=transcendentals,
                           bytes_accessed=int(wbytes + abytes))

    return pl.pallas_call(
        kernel,
        grid=(B // Bb, L),
        in_specs=in_specs,
        out_specs=pl.BlockSpec((Bb, S, H), lambda b, l: (b, 0, 0)),
        out_shape=jax.ShapeDtypeStruct((B, S, H), out_dtype),
        scratch_shapes=[pltpu.VMEM((Bb * S, H), jnp.float32),     # residual carry
                        pltpu.VMEM((Bb * S, H), compute_dtype)],  # head-concat buffer
        compiler_params=pltpu.CompilerParams(
            dimension_semantics=("parallel", "arbitrary"),
            vmem_limit_bytes=int(vmem_limit)),
        cost_estimate=cost,
    )(seqs, keep, *per_layer, *last)


def init_params(key, num_layers, hidden):
    L, H = num_layers, hidden
    ks = jax.random.split(key, 14)

    def nrm(k, shape, s=0.05):
        return (s * jax.random.normal(k, shape)).astype(jnp.float32)

    return {
        # attention LayerNorms
        "ln1_g": (jnp.ones((L, 1, H)) + nrm(ks[0], (L, 1, H), 0.01)).astype(jnp.float32),
        "ln1_b": nrm(ks[1], (L, 1, H), 0.01),
        # nn.MultiheadAttention: in_proj (3H, H) -> stored transposed (H, 3H) [q|k|v];
        # out_proj (H, H) -> stored transposed (H, H)
        "wqkv_t": nrm(ks[2], (L, H, 3 * H)),
        "bqkv":   nrm(ks[3], (L, 1, 3 * H), 0.01),
        "wo_t":   nrm(ks[4], (L, H, H)),
        "bo":     nrm(ks[5], (L, 1, H), 0.01),
        # forward LayerNorms
        "ln2_g": (jnp.ones((L, 1, H)) + nrm(ks[6], (L, 1, H), 0.01)).astype(jnp.float32),
        "ln2_b": nrm(ks[7], (L, 1, H), 0.01),
        # PointWiseFeedForward: conv1d(k=1) weights (H, H, 1) -> stored transposed (H, H)
        "w1_t": nrm(ks[8], (L, H, H)),
        "b1":   nrm(ks[9], (L, 1, H), 0.01),
        "w2_t": nrm(ks[10], (L, H, H)),
        "b2":   nrm(ks[11], (L, 1, H), 0.01),
        # last LayerNorm
        "last_g": (jnp.ones((1, H)) + nrm(ks[12], (1, H), 0.01)).astype(jnp.float32),
        "last_b": nrm(ks[13], (1, H), 0.01),
    }


def reference(seqs, log_seqs, params, num_heads):
    """Pure-JAX reference mirroring the PyTorch forward (eval mode, f32)."""
    B, S, H = seqs.shape
    L = params["ln1_g"].shape[0]
    hd = H // num_heads
    keep = (log_seqs != 0).astype(seqs.dtype)[:, :, None]

    def ln(x, g, b, eps=1e-8):
        mu = jnp.mean(x, axis=-1, keepdims=True)
        var = jnp.mean((x - mu) ** 2, axis=-1, keepdims=True)
        return (x - mu) / jnp.sqrt(var + eps) * g + b

    x = seqs * keep
    for l in range(L):
        w, bq = params["wqkv_t"][l], params["bqkv"][l]
        q_in = ln(x, params["ln1_g"][l], params["ln1_b"][l])
        q = q_in @ w[:, :H] + bq[:, :H]
        k = x @ w[:, H:2 * H] + bq[:, H:2 * H]
        v = x @ w[:, 2 * H:] + bq[:, 2 * H:]
        qh = q.reshape(B, S, num_heads, hd).transpose(0, 2, 1, 3)
        kh = k.reshape(B, S, num_heads, hd).transpose(0, 2, 1, 3)
        vh = v.reshape(B, S, num_heads, hd).transpose(0, 2, 1, 3)
        s = jnp.einsum("bhqd,bhkd->bhqk", qh, kh) / jnp.sqrt(jnp.float32(hd))
        p = jax.nn.softmax(s, axis=-1)
        o = jnp.einsum("bhqk,bhkd->bhqd", p, vh).transpose(0, 2, 1, 3).reshape(B, S, H)
        attn = o @ params["wo_t"][l] + params["bo"][l]
        x = q_in + attn
        x = ln(x, params["ln2_g"][l], params["ln2_b"][l])
        h1 = jnp.maximum(x @ params["w1_t"][l] + params["b1"][l], 0.0)
        x = x + (h1 @ params["w2_t"][l] + params["b2"][l])
        x = x * keep
    return ln(x, params["last_g"], params["last_b"])


if __name__ == "__main__":
    B, S, H = 4, 8, 32          # batch, seq len, hidden_size
    NUM_HEADS = 2               # args.num_heads
    TRM_NUM = 2                 # args.trm_num

    root = jax.random.PRNGKey(0)
    k_seqs, k_ids, k_params = jax.random.split(root, 3)

    seqs = jax.random.normal(k_seqs, (B, S, H), dtype=jnp.float32)
    log_seqs = jax.random.randint(k_ids, (B, S), 0, 4, dtype=jnp.int32)  # zeros => padding

    params = init_params(k_params, TRM_NUM, H)
    ref = reference(seqs, log_seqs, params, NUM_HEADS)

    # f32 MXU-operand path with explicit block_b: tight validation (exact softmax).
    out_f32 = bert_backbone(seqs, log_seqs, params, NUM_HEADS,
                            block_b=2, compute_dtype=jnp.float32)
    out_f32 = jax.block_until_ready(out_f32)
    assert out_f32.shape == (B, S, H)
    assert jnp.allclose(out_f32, ref, atol=5e-3, rtol=5e-3), "f32 path mismatch vs reference"

    # bf16 MXU-operand, bf16-output production path with auto (generation-aware) block_b.
    out_bf16 = bert_backbone(seqs, log_seqs, params, NUM_HEADS,
                             compute_dtype=jnp.bfloat16, out_dtype=jnp.bfloat16)
    out_bf16 = jax.block_until_ready(out_bf16)
    assert out_bf16.shape == (B, S, H)
    assert jnp.allclose(out_bf16.astype(jnp.float32), ref,
                        atol=5e-2, rtol=5e-2), "bf16 path mismatch vs reference"

    print("KERNEL_OK")
</pallas_src>

<mosaic_0001>
module attributes {stable_mosaic.version = 11 : i64} {
  func.func @bert_backbone_kernel(%arg0: i32, %arg1: i32, %arg2: memref<2x8x32xf32, #tpu.memory_space<vmem>>, %arg3: memref<2x8x1xf32, #tpu.memory_space<vmem>>, %arg4: memref<1x1x32xf32, #tpu.memory_space<vmem>>, %arg5: memref<1x1x32xf32, #tpu.memory_space<vmem>>, %arg6: memref<1x32x96xf32, #tpu.memory_space<vmem>>, %arg7: memref<1x1x96xf32, #tpu.memory_space<vmem>>, %arg8: memref<1x32x32xf32, #tpu.memory_space<vmem>>, %arg9: memref<1x1x32xf32, #tpu.memory_space<vmem>>, %arg10: memref<1x1x32xf32, #tpu.memory_space<vmem>>, %arg11: memref<1x1x32xf32, #tpu.memory_space<vmem>>, %arg12: memref<1x32x32xf32, #tpu.memory_space<vmem>>, %arg13: memref<1x1x32xf32, #tpu.memory_space<vmem>>, %arg14: memref<1x32x32xf32, #tpu.memory_space<vmem>>, %arg15: memref<1x1x32xf32, #tpu.memory_space<vmem>>, %arg16: memref<1x32xf32, #tpu.memory_space<vmem>>, %arg17: memref<1x32xf32, #tpu.memory_space<vmem>>, %arg18: memref<2x8x32xf32, #tpu.memory_space<vmem>>, %arg19: memref<16x32xf32, #tpu.memory_space<vmem>>, %arg20: memref<16x32xf32, #tpu.memory_space<vmem>>) attributes {dimension_semantics = [#tpu.dimension_semantics<parallel>, #tpu.dimension_semantics<arbitrary>], iteration_bounds = array<i64: 2, 2>, scalar_prefetch = 0 : i64, scratch_operands = 2 : i64, tpu.core_type = #tpu.core_type<tc>, window_params = [{transform_indices = @transform_0, window_bounds = array<i64: 2, 8, 32>}, {transform_indices = @transform_1, window_bounds = array<i64: 2, 8, 1>}, {transform_indices = @transform_2, window_bounds = array<i64: 1, 1, 32>}, {transform_indices = @transform_3, window_bounds = array<i64: 1, 1, 32>}, {transform_indices = @transform_4, window_bounds = array<i64: 1, 32, 96>}, {transform_indices = @transform_5, window_bounds = array<i64: 1, 1, 96>}, {transform_indices = @transform_6, window_bounds = array<i64: 1, 32, 32>}, {transform_indices = @transform_7, window_bounds = array<i64: 1, 1, 32>}, {transform_indices = @transform_8, window_bounds = array<i64: 1, 1, 32>}, {transform_indices = @transform_9, window_bounds = array<i64: 1, 1, 32>}, {transform_indices = @transform_10, window_bounds = array<i64: 1, 32, 32>}, {transform_indices = @transform_11, window_bounds = array<i64: 1, 1, 32>}, {transform_indices = @transform_12, window_bounds = array<i64: 1, 32, 32>}, {transform_indices = @transform_13, window_bounds = array<i64: 1, 1, 32>}, {pipeline_mode = #tpu.pipeline_mode<synchronous>, transform_indices = @transform_14, window_bounds = array<i64: 1, 32>}, {pipeline_mode = #tpu.pipeline_mode<synchronous>, transform_indices = @transform_15, window_bounds = array<i64: 1, 32>}, {transform_indices = @transform_16, window_bounds = array<i64: 2, 8, 32>}]} {
    %c0 = arith.constant 0 : index
    %c0_0 = arith.constant 0 : index
    %c0_1 = arith.constant 0 : index
    %0 = vector.load %arg3[%c0, %c0_0, %c0_1] : memref<2x8x1xf32, #tpu.memory_space<vmem>>, vector<2x8x1xf32>
    %1 = vector.shape_cast %0 : vector<2x8x1xf32> to vector<16x1xf32>
    %c0_i32 = arith.constant 0 : i32
    %2 = arith.cmpi eq, %arg1, %c0_i32 : i32
    %3 = arith.extui %2 : i1 to i32
    %c0_i32_2 = arith.constant 0 : i32
    %4 = arith.cmpi ne, %3, %c0_i32_2 : i32
    scf.if %4 {
      %c0_68 = arith.constant 0 : index
      %c0_69 = arith.constant 0 : index
      %c0_70 = arith.constant 0 : index
      %131 = vector.load %arg2[%c0_68, %c0_69, %c0_70] : memref<2x8x32xf32, #tpu.memory_space<vmem>>, vector<2x8x32xf32>
      %132 = vector.shape_cast %131 : vector<2x8x32xf32> to vector<16x32xf32>
      %133 = vector.broadcast %1 : vector<16x1xf32> to vector<16x32xf32>
      %134 = arith.mulf %132, %133 : vector<16x32xf32>
      %c0_71 = arith.constant 0 : index
      %c0_72 = arith.constant 0 : index
      %135 = vector.load %arg19[%c0_71, %c0_72] : memref<16x32xf32, #tpu.memory_space<vmem>>, vector<16x32xf32>
      tpu.vector_store %arg19[%c0_71, %c0_72], %134 {strides = array<i32>} : memref<16x32xf32, #tpu.memory_space<vmem>>, vector<16x32xf32>,
    } else {
    }
    %c0_3 = arith.constant 0 : index
    %c0_4 = arith.constant 0 : index
    %5 = vector.load %arg19[%c0_3, %c0_4] : memref<16x32xf32, #tpu.memory_space<vmem>>, vector<16x32xf32>
    %c0_5 = arith.constant 0 : index
    %c0_6 = arith.constant 0 : index
    %c0_7 = arith.constant 0 : index
    %6 = vector.load %arg6[%c0_5, %c0_6, %c0_7] : memref<1x32x96xf32, #tpu.memory_space<vmem>>, vector<1x32x96xf32>
    %7 = vector.shape_cast %6 : vector<1x32x96xf32> to vector<32x96xf32>
    %c0_8 = arith.constant 0 : index
    %c0_9 = arith.constant 0 : index
    %c0_10 = arith.constant 0 : index
    %8 = vector.load %arg7[%c0_8, %c0_9, %c0_10] : memref<1x1x96xf32, #tpu.memory_space<vmem>>, vector<1x1x96xf32>
    %9 = vector.shape_cast %8 : vector<1x1x96xf32> to vector<1x96xf32>
    %c0_11 = arith.constant 0 : index
    %c0_12 = arith.constant 0 : index
    %c0_13 = arith.constant 0 : index
    %10 = vector.load %arg4[%c0_11, %c0_12, %c0_13] : memref<1x1x32xf32, #tpu.memory_space<vmem>>, vector<1x1x32xf32>
    %11 = vector.shape_cast %10 : vector<1x1x32xf32> to vector<1x32xf32>
    %c0_14 = arith.constant 0 : index
    %c0_15 = arith.constant 0 : index
    %c0_16 = arith.constant 0 : index
    %12 = vector.load %arg5[%c0_14, %c0_15, %c0_16] : memref<1x1x32xf32, #tpu.memory_space<vmem>>, vector<1x1x32xf32>
    %13 = vector.shape_cast %12 : vector<1x1x32xf32> to vector<1x32xf32>
    %cst = arith.constant dense<0.000000e+00> : vector<16xf32>
    %14 = vector.multi_reduction <add>, %5, %cst [1] : vector<16x32xf32> to vector<16xf32>
    %15 = vector.shape_cast %14 : vector<16xf32> to vector<16x1xf32>
    %cst_17 = arith.constant 3.200000e+01 : f32
    %16 = vector.broadcast %cst_17 : f32 to vector<16x1xf32>
    %17 = arith.divf %15, %16 : vector<16x1xf32>
    %18 = vector.broadcast %17 : vector<16x1xf32> to vector<16x32xf32>
    %19 = arith.subf %5, %18 : vector<16x32xf32>
    %20 = arith.mulf %19, %19 : vector<16x32xf32>
    %cst_18 = arith.constant dense<0.000000e+00> : vector<16xf32>
    %21 = vector.multi_reduction <add>, %20, %cst_18 [1] : vector<16x32xf32> to vector<16xf32>
    %22 = vector.shape_cast %21 : vector<16xf32> to vector<16x1xf32>
    %cst_19 = arith.constant 3.200000e+01 : f32
    %23 = vector.broadcast %cst_19 : f32 to vector<16x1xf32>
    %24 = arith.divf %22, %23 : vector<16x1xf32>
    %cst_20 = arith.constant 9.99999993E-9 : f32
    %25 = vector.broadcast %cst_20 : f32 to vector<16x1xf32>
    %26 = arith.addf %24, %25 : vector<16x1xf32>
    %27 = math.rsqrt %26 : vector<16x1xf32>
    %28 = vector.broadcast %27 : vector<16x1xf32> to vector<16x32xf32>
    %29 = arith.mulf %19, %28 : vector<16x32xf32>
    %30 = vector.broadcast %11 : vector<1x32xf32> to vector<16x32xf32>
    %31 = arith.mulf %29, %30 : vector<16x32xf32>
    %32 = vector.broadcast %13 : vector<1x32xf32> to vector<16x32xf32>
    %33 = arith.addf %31, %32 : vector<16x32xf32>
    %34 = vector.extract_strided_slice %7 {offsets = [0, 0], sizes = [32, 32], strides = [1, 1]} : vector<32x96xf32> to vector<32x32xf32>
    %cst_21 = arith.constant dense<0.000000e+00> : vector<16x32xf32>
    %35 = tpu.matmul %33, %34, %cst_21 {dimension_numbers = #tpu.dot_dimension_numbers<[1], [0], [0], [1], [0, 0, 1, 1], [], []>} : vector<16x32xf32>, vector<32x32xf32>, vector<16x32xf32> -> vector<16x32xf32>
    %36 = vector.extract_strided_slice %9 {offsets = [0, 0], sizes = [1, 32], strides = [1, 1]} : vector<1x96xf32> to vector<1x32xf32>
    %37 = vector.broadcast %36 : vector<1x32xf32> to vector<16x32xf32>
    %38 = arith.addf %35, %37 : vector<16x32xf32>
    %39 = vector.extract_strided_slice %7 {offsets = [0, 32], sizes = [32, 64], strides = [1, 1]} : vector<32x96xf32> to vector<32x64xf32>
    %cst_22 = arith.constant dense<0.000000e+00> : vector<16x64xf32>
    %40 = tpu.matmul %5, %39, %cst_22 {dimension_numbers = #tpu.dot_dimension_numbers<[1], [0], [0], [1], [0, 0, 1, 1], [], []>} : vector<16x32xf32>, vector<32x64xf32>, vector<16x64xf32> -> vector<16x64xf32>
    %41 = vector.extract_strided_slice %9 {offsets = [0, 32], sizes = [1, 64], strides = [1, 1]} : vector<1x96xf32> to vector<1x64xf32>
    %42 = vector.broadcast %41 : vector<1x64xf32> to vector<16x64xf32>
    %43 = arith.addf %40, %42 : vector<16x64xf32>
    %44 = vector.shape_cast %38 : vector<16x32xf32> to vector<2x8x32xf32>
    %45 = vector.extract_strided_slice %43 {offsets = [0, 0], sizes = [16, 32], strides = [1, 1]} : vector<16x64xf32> to vector<16x32xf32>
    %46 = vector.shape_cast %45 : vector<16x32xf32> to vector<2x8x32xf32>
    %47 = vector.extract_strided_slice %43 {offsets = [0, 32], sizes = [16, 32], strides = [1, 1]} : vector<16x64xf32> to vector<16x32xf32>
    %48 = vector.shape_cast %47 : vector<16x32xf32> to vector<2x8x32xf32>
    %49 = vector.extract_strided_slice %44 {offsets = [0, 0, 0], sizes = [2, 8, 16], strides = [1, 1, 1]} : vector<2x8x32xf32> to vector<2x8x16xf32>
    %50 = vector.extract_strided_slice %44 {offsets = [0, 0, 16], sizes = [2, 8, 16], strides = [1, 1, 1]} : vector<2x8x32xf32> to vector<2x8x16xf32>
    %51 = tpu.concatenate %49, %50 in 0 : vector<2x8x16xf32>, vector<2x8x16xf32> -> vector<4x8x16xf32>
    %52 = vector.extract_strided_slice %46 {offsets = [0, 0, 0], sizes = [2, 8, 16], strides = [1, 1, 1]} : vector<2x8x32xf32> to vector<2x8x16xf32>
    %53 = vector.extract_strided_slice %46 {offsets = [0, 0, 16], sizes = [2, 8, 16], strides = [1, 1, 1]} : vector<2x8x32xf32> to vector<2x8x16xf32>
    %54 = tpu.concatenate %52, %53 in 0 : vector<2x8x16xf32>, vector<2x8x16xf32> -> vector<4x8x16xf32>
    %55 = vector.extract_strided_slice %48 {offsets = [0, 0, 0], sizes = [2, 8, 16], strides = [1, 1, 1]} : vector<2x8x32xf32> to vector<2x8x16xf32>
    %56 = vector.extract_strided_slice %48 {offsets = [0, 0, 16], sizes = [2, 8, 16], strides = [1, 1, 1]} : vector<2x8x32xf32> to vector<2x8x16xf32>
    %57 = tpu.concatenate %55, %56 in 0 : vector<2x8x16xf32>, vector<2x8x16xf32> -> vector<4x8x16xf32>
    "tpu.trace_start"() <{level = 10 : i32, message = "bqd,bkd->bqk"}> : () -> ()
    %cst_23 = arith.constant dense<0.000000e+00> : vector<4x8x8xf32>
    %58 = tpu.matmul %51, %54, %cst_23 {dimension_numbers = #tpu.dot_dimension_numbers<[2], [2], [1], [1], [0, 0, 0, 1, 1, 1], [0], [0]>} : vector<4x8x16xf32>, vector<4x8x16xf32>, vector<4x8x8xf32> -> vector<4x8x8xf32>
    "tpu.trace_stop"() : () -> ()
    %cst_24 = arith.constant dense<0xFF800000> : vector<4x8xf32>
    %59 = vector.multi_reduction <maximumf>, %58, %cst_24 [2] : vector<4x8x8xf32> to vector<4x8xf32>
    %60 = vector.shape_cast %59 : vector<4x8xf32> to vector<4x8x1xf32>
    %61 = vector.broadcast %60 : vector<4x8x1xf32> to vector<4x8x8xf32>
    %62 = arith.subf %58, %61 : vector<4x8x8xf32>
    %63 = math.exp %62 : vector<4x8x8xf32>
    %cst_25 = arith.constant dense<0.000000e+00> : vector<4x8xf32>
    %64 = vector.multi_reduction <add>, %63, %cst_25 [2] : vector<4x8x8xf32> to vector<4x8xf32>
    %65 = vector.shape_cast %64 : vector<4x8xf32> to vector<4x8x1xf32>
    %66 = vector.broadcast %65 : vector<4x8x1xf32> to vector<4x8x8xf32>
    %67 = arith.divf %63, %66 : vector<4x8x8xf32>
    "tpu.trace_start"() <{level = 10 : i32, message = "bqk,bkd->bqd"}> : () -> ()
    %cst_26 = arith.constant dense<0.000000e+00> : vector<4x8x16xf32>
    %68 = tpu.matmul %67, %57, %cst_26 {dimension_numbers = #tpu.dot_dimension_numbers<[2], [1], [1], [2], [0, 0, 0, 1, 1, 2], [0], [0]>} : vector<4x8x8xf32>, vector<4x8x16xf32>, vector<4x8x16xf32> -> vector<4x8x16xf32>
    "tpu.trace_stop"() : () -> ()
    %69 = vector.extract_strided_slice %68 {offsets = [0, 0, 0], sizes = [2, 8, 16], strides = [1, 1, 1]} : vector<4x8x16xf32> to vector<2x8x16xf32>
    %70 = vector.shape_cast %69 : vector<2x8x16xf32> to vector<16x16xf32>
    %c0_27 = arith.constant 0 : index
    %c0_28 = arith.constant 0 : index
    %71 = vector.load %arg20[%c0_27, %c0_28] : memref<16x32xf32, #tpu.memory_space<vmem>>, vector<16x16xf32>
    tpu.vector_store %arg20[%c0_27, %c0_28], %70 {strides = array<i32>} : memref<16x32xf32, #tpu.memory_space<vmem>>, vector<16x16xf32>,
    %72 = vector.extract_strided_slice %68 {offsets = [2, 0, 0], sizes = [2, 8, 16], strides = [1, 1, 1]} : vector<4x8x16xf32> to vector<2x8x16xf32>
    %73 = vector.shape_cast %72 : vector<2x8x16xf32> to vector<16x16xf32>
    %c0_29 = arith.constant 0 : index
    %c16 = arith.constant 16 : index
    %74 = vector.load %arg20[%c0_29, %c16] : memref<16x32xf32, #tpu.memory_space<vmem>>, vector<16x16xf32>
    tpu.vector_store %arg20[%c0_29, %c16], %73 {strides = array<i32>} : memref<16x32xf32, #tpu.memory_space<vmem>>, vector<16x16xf32>,
    %c0_30 = arith.constant 0 : index
    %c0_31 = arith.constant 0 : index
    %75 = vector.load %arg20[%c0_30, %c0_31] : memref<16x32xf32, #tpu.memory_space<vmem>>, vector<16x32xf32>
    %c0_32 = arith.constant 0 : index
    %c0_33 = arith.constant 0 : index
    %c0_34 = arith.constant 0 : index
    %76 = vector.load %arg8[%c0_32, %c0_33, %c0_34] : memref<1x32x32xf32, #tpu.memory_space<vmem>>, vector<1x32x32xf32>
    %77 = vector.shape_cast %76 : vector<1x32x32xf32> to vector<32x32xf32>
    %cst_35 = arith.constant dense<0.000000e+00> : vector<16x32xf32>
    %78 = tpu.matmul %75, %77, %cst_35 {dimension_numbers = #tpu.dot_dimension_numbers<[1], [0], [0], [1], [0, 0, 1, 1], [], []>} : vector<16x32xf32>, vector<32x32xf32>, vector<16x32xf32> -> vector<16x32xf32>
    %c0_36 = arith.constant 0 : index
    %c0_37 = arith.constant 0 : index
    %c0_38 = arith.constant 0 : index
    %79 = vector.load %arg9[%c0_36, %c0_37, %c0_38] : memref<1x1x32xf32, #tpu.memory_space<vmem>>, vector<1x1x32xf32>
    %80 = vector.shape_cast %79 : vector<1x1x32xf32> to vector<1x32xf32>
    %81 = vector.broadcast %80 : vector<1x32xf32> to vector<16x32xf32>
    %82 = arith.addf %78, %81 : vector<16x32xf32>
    %83 = arith.addf %33, %82 : vector<16x32xf32>
    %c0_39 = arith.constant 0 : index
    %c0_40 = arith.constant 0 : index
    %c0_41 = arith.constant 0 : index
    %84 = vector.load %arg10[%c0_39, %c0_40, %c0_41] : memref<1x1x32xf32, #tpu.memory_space<vmem>>, vector<1x1x32xf32>
    %85 = vector.shape_cast %84 : vector<1x1x32xf32> to vector<1x32xf32>
    %c0_42 = arith.constant 0 : index
    %c0_43 = arith.constant 0 : index
    %c0_44 = arith.constant 0 : index
    %86 = vector.load %arg11[%c0_42, %c0_43, %c0_44] : memref<1x1x32xf32, #tpu.memory_space<vmem>>, vector<1x1x32xf32>
    %87 = vector.shape_cast %86 : vector<1x1x32xf32> to vector<1x32xf32>
    %cst_45 = arith.constant dense<0.000000e+00> : vector<16xf32>
    %88 = vector.multi_reduction <add>, %83, %cst_45 [1] : vector<16x32xf32> to vector<16xf32>
    %89 = vector.shape_cast %88 : vector<16xf32> to vector<16x1xf32>
    %cst_46 = arith.constant 3.200000e+01 : f32
    %90 = vector.broadcast %cst_46 : f32 to vector<16x1xf32>
    %91 = arith.divf %89, %90 : vector<16x1xf32>
    %92 = vector.broadcast %91 : vector<16x1xf32> to vector<16x32xf32>
    %93 = arith.subf %83, %92 : vector<16x32xf32>
    %94 = arith.mulf %93, %93 : vector<16x32xf32>
    %cst_47 = arith.constant dense<0.000000e+00> : vector<16xf32>
    %95 = vector.multi_reduction <add>, %94, %cst_47 [1] : vector<16x32xf32> to vector<16xf32>
    %96 = vector.shape_cast %95 : vector<16xf32> to vector<16x1xf32>
    %cst_48 = arith.constant 3.200000e+01 : f32
    %97 = vector.broadcast %cst_48 : f32 to vector<16x1xf32>
    %98 = arith.divf %96, %97 : vector<16x1xf32>
    %cst_49 = arith.constant 9.99999993E-9 : f32
    %99 = vector.broadcast %cst_49 : f32 to vector<16x1xf32>
    %100 = arith.addf %98, %99 : vector<16x1xf32>
    %101 = math.rsqrt %100 : vector<16x1xf32>
    %102 = vector.broadcast %101 : vector<16x1xf32> to vector<16x32xf32>
    %103 = arith.mulf %93, %102 : vector<16x32xf32>
    %104 = vector.broadcast %85 : vector<1x32xf32> to vector<16x32xf32>
    %105 = arith.mulf %103, %104 : vector<16x32xf32>
    %106 = vector.broadcast %87 : vector<1x32xf32> to vector<16x32xf32>
    %107 = arith.addf %105, %106 : vector<16x32xf32>
    %c0_50 = arith.constant 0 : index
    %c0_51 = arith.constant 0 : index
    %c0_52 = arith.constant 0 : index
    %108 = vector.load %arg12[%c0_50, %c0_51, %c0_52] : memref<1x32x32xf32, #tpu.memory_space<vmem>>, vector<1x32x32xf32>
    %109 = vector.shape_cast %108 : vector<1x32x32xf32> to vector<32x32xf32>
    %cst_53 = arith.constant dense<0.000000e+00> : vector<16x32xf32>
    %110 = tpu.matmul %107, %109, %cst_53 {dimension_numbers = #tpu.dot_dimension_numbers<[1], [0], [0], [1], [0, 0, 1, 1], [], []>} : vector<16x32xf32>, vector<32x32xf32>, vector<16x32xf32> -> vector<16x32xf32>
    %c0_54 = arith.constant 0 : index
    %c0_55 = arith.constant 0 : index
    %c0_56 = arith.constant 0 : index
    %111 = vector.load %arg13[%c0_54, %c0_55, %c0_56] : memref<1x1x32xf32, #tpu.memory_space<vmem>>, vector<1x1x32xf32>
    %112 = vector.shape_cast %111 : vector<1x1x32xf32> to vector<1x32xf32>
    %113 = vector.broadcast %112 : vector<1x32xf32> to vector<16x32xf32>
    %114 = arith.addf %110, %113 : vector<16x32xf32>
    %cst_57 = arith.constant 0.000000e+00 : f32
    %115 = vector.broadcast %cst_57 : f32 to vector<16x32xf32>
    %116 = arith.maximumf %114, %115 : vector<16x32xf32>
    %c0_58 = arith.constant 0 : index
    %c0_59 = arith.constant 0 : index
    %c0_60 = arith.constant 0 : index
    %117 = vector.load %arg14[%c0_58, %c0_59, %c0_60] : memref<1x32x32xf32, #tpu.memory_space<vmem>>, vector<1x32x32xf32>
    %118 = vector.shape_cast %117 : vector<1x32x32xf32> to vector<32x32xf32>
    %cst_61 = arith.constant dense<0.000000e+00> : vector<16x32xf32>
    %119 = tpu.matmul %116, %118, %cst_61 {dimension_numbers = #tpu.dot_dimension_numbers<[1], [0], [0], [1], [0, 0, 1, 1], [], []>} : vector<16x32xf32>, vector<32x32xf32>, vector<16x32xf32> -> vector<16x32xf32>
    %c0_62 = arith.constant 0 : index
    %c0_63 = arith.constant 0 : index
    %c0_64 = arith.constant 0 : index
    %120 = vector.load %arg15[%c0_62, %c0_63, %c0_64] : memref<1x1x32xf32, #tpu.memory_space<vmem>>, vector<1x1x32xf32>
    %121 = vector.shape_cast %120 : vector<1x1x32xf32> to vector<1x32xf32>
    %122 = vector.broadcast %121 : vector<1x32xf32> to vector<16x32xf32>
    %123 = arith.addf %119, %122 : vector<16x32xf32>
    %124 = arith.addf %107, %123 : vector<16x32xf32>
    %125 = vector.broadcast %1 : vector<16x1xf32> to vector<16x32xf32>
    %126 = arith.mulf %124, %125 : vector<16x32xf32>
    %c0_65 = arith.constant 0 : index
    %c0_66 = arith.constant 0 : index
    %127 = vector.load %arg19[%c0_65, %c0_66] : memref<16x32xf32, #tpu.memory_space<vmem>>, vector<16x32xf32>
    tpu.vector_store %arg19[%c0_65, %c0_66], %126 {strides = array<i32>} : memref<16x32xf32, #tpu.memory_space<vmem>>, vector<16x32xf32>,
    %c1_i32 = arith.constant 1 : i32
    %128 = arith.cmpi eq, %arg1, %c1_i32 : i32
    %129 = arith.extui %128 : i1 to i32
    %c0_i32_67 = arith.constant 0 : i32
    %130 = arith.cmpi ne, %129, %c0_i32_67 : i32
    scf.if %130 {
      %c0_68 = arith.constant 0 : index
      %c0_69 = arith.constant 0 : index
      %131 = vector.load %arg16[%c0_68, %c0_69] : memref<1x32xf32, #tpu.memory_space<vmem>>, vector<1x32xf32>
      %c0_70 = arith.constant 0 : index
      %c0_71 = arith.constant 0 : index
      %132 = vector.load %arg17[%c0_70, %c0_71] : memref<1x32xf32, #tpu.memory_space<vmem>>, vector<1x32xf32>
      %cst_72 = arith.constant dense<0.000000e+00> : vector<16xf32>
      %133 = vector.multi_reduction <add>, %126, %cst_72 [1] : vector<16x32xf32> to vector<16xf32>
      %134 = vector.shape_cast %133 : vector<16xf32> to vector<16x1xf32>
      %cst_73 = arith.constant 3.200000e+01 : f32
      %135 = vector.broadcast %cst_73 : f32 to vector<16x1xf32>
      %136 = arith.divf %134, %135 : vector<16x1xf32>
      %137 = vector.broadcast %136 : vector<16x1xf32> to vector<16x32xf32>
      %138 = arith.subf %126, %137 : vector<16x32xf32>
      %139 = arith.mulf %138, %138 : vector<16x32xf32>
      %cst_74 = arith.constant dense<0.000000e+00> : vector<16xf32>
      %140 = vector.multi_reduction <add>, %139, %cst_74 [1] : vector<16x32xf32> to vector<16xf32>
      %141 = vector.shape_cast %140 : vector<16xf32> to vector<16x1xf32>
      %cst_75 = arith.constant 3.200000e+01 : f32
      %142 = vector.broadcast %cst_75 : f32 to vector<16x1xf32>
      %143 = arith.divf %141, %142 : vector<16x1xf32>
      %cst_76 = arith.constant 9.99999993E-9 : f32
      %144 = vector.broadcast %cst_76 : f32 to vector<16x1xf32>
      %145 = arith.addf %143, %144 : vector<16x1xf32>
      %146 = math.rsqrt %145 : vector<16x1xf32>
      %147 = vector.broadcast %146 : vector<16x1xf32> to vector<16x32xf32>
      %148 = arith.mulf %138, %147 : vector<16x32xf32>
      %149 = vector.broadcast %131 : vector<1x32xf32> to vector<16x32xf32>
      %150 = arith.mulf %148, %149 : vector<16x32xf32>
      %151 = vector.broadcast %132 : vector<1x32xf32> to vector<16x32xf32>
      %152 = arith.addf %150, %151 : vector<16x32xf32>
      %153 = vector.shape_cast %152 : vector<16x32xf32> to vector<2x8x32xf32>
      %c0_77 = arith.constant 0 : index
      %c0_78 = arith.constant 0 : index
      %c0_79 = arith.constant 0 : index
      %154 = vector.load %arg18[%c0_77, %c0_78, %c0_79] : memref<2x8x32xf32, #tpu.memory_space<vmem>>, vector<2x8x32xf32>
      tpu.vector_store %arg18[%c0_77, %c0_78, %c0_79], %153 {strides = array<i32>} : memref<2x8x32xf32, #tpu.memory_space<vmem>>, vector<2x8x32xf32>,
    } else {
    }
    return
  }
  func.func @transform_0(%arg0: i32, %arg1: i32) -> (i32, i32, i32) {
    %c0_i32 = arith.constant 0 : i32
    %c0_i32_0 = arith.constant 0 : i32
    %c0_i32_1 = arith.constant 0 : i32
    return %arg0, %c0_i32, %c0_i32_0 : i32, i32, i32
  }
  func.func @transform_1(%arg0: i32, %arg1: i32) -> (i32, i32, i32) {
    %c0_i32 = arith.constant 0 : i32
    %c0_i32_0 = arith.constant 0 : i32
    %c0_i32_1 = arith.constant 0 : i32
    return %arg0, %c0_i32, %c0_i32_0 : i32, i32, i32
  }
  func.func @transform_2(%arg0: i32, %arg1: i32) -> (i32, i32, i32) {
    %c0_i32 = arith.constant 0 : i32
    %c0_i32_0 = arith.constant 0 : i32
    %c0_i32_1 = arith.constant 0 : i32
    return %arg1, %c0_i32, %c0_i32_0 : i32, i32, i32
  }
  func.func @transform_3(%arg0: i32, %arg1: i32) -> (i32, i32, i32) {
    %c0_i32 = arith.constant 0 : i32
    %c0_i32_0 = arith.constant 0 : i32
    %c0_i32_1 = arith.constant 0 : i32
    return %arg1, %c0_i32, %c0_i32_0 : i32, i32, i32
  }
  func.func @transform_4(%arg0: i32, %arg1: i32) -> (i32, i32, i32) {
    %c0_i32 = arith.constant 0 : i32
    %c0_i32_0 = arith.constant 0 : i32
    %c0_i32_1 = arith.constant 0 : i32
    return %arg1, %c0_i32, %c0_i32_0 : i32, i32, i32
  }
  func.func @transform_5(%arg0: i32, %arg1: i32) -> (i32, i32, i32) {
    %c0_i32 = arith.constant 0 : i32
    %c0_i32_0 = arith.constant 0 : i32
    %c0_i32_1 = arith.constant 0 : i32
    return %arg1, %c0_i32, %c0_i32_0 : i32, i32, i32
  }
  func.func @transform_6(%arg0: i32, %arg1: i32) -> (i32, i32, i32) {
    %c0_i32 = arith.constant 0 : i32
    %c0_i32_0 = arith.constant 0 : i32
    %c0_i32_1 = arith.constant 0 : i32
    return %arg1, %c0_i32, %c0_i32_0 : i32, i32, i32
  }
  func.func @transform_7(%arg0: i32, %arg1: i32) -> (i32, i32, i32) {
    %c0_i32 = arith.constant 0 : i32
    %c0_i32_0 = arith.constant 0 : i32
    %c0_i32_1 = arith.constant 0 : i32
    return %arg1, %c0_i32, %c0_i32_0 : i32, i32, i32
  }
  func.func @transform_8(%arg0: i32, %arg1: i32) -> (i32, i32, i32) {
    %c0_i32 = arith.constant 0 : i32
    %c0_i32_0 = arith.constant 0 : i32
    %c0_i32_1 = arith.constant 0 : i32
    return %arg1, %c0_i32, %c0_i32_0 : i32, i32, i32
  }
  func.func @transform_9(%arg0: i32, %arg1: i32) -> (i32, i32, i32) {
    %c0_i32 = arith.constant 0 : i32
    %c0_i32_0 = arith.constant 0 : i32
    %c0_i32_1 = arith.constant 0 : i32
    return %arg1, %c0_i32, %c0_i32_0 : i32, i32, i32
  }
  func.func @transform_10(%arg0: i32, %arg1: i32) -> (i32, i32, i32) {
    %c0_i32 = arith.constant 0 : i32
    %c0_i32_0 = arith.constant 0 : i32
    %c0_i32_1 = arith.constant 0 : i32
    return %arg1, %c0_i32, %c0_i32_0 : i32, i32, i32
  }
  func.func @transform_11(%arg0: i32, %arg1: i32) -> (i32, i32, i32) {
    %c0_i32 = arith.constant 0 : i32
    %c0_i32_0 = arith.constant 0 : i32
    %c0_i32_1 = arith.constant 0 : i32
    return %arg1, %c0_i32, %c0_i32_0 : i32, i32, i32
  }
  func.func @transform_12(%arg0: i32, %arg1: i32) -> (i32, i32, i32) {
    %c0_i32 = arith.constant 0 : i32
    %c0_i32_0 = arith.constant 0 : i32
    %c0_i32_1 = arith.constant 0 : i32
    return %arg1, %c0_i32, %c0_i32_0 : i32, i32, i32
  }
  func.func @transform_13(%arg0: i32, %arg1: i32) -> (i32, i32, i32) {
    %c0_i32 = arith.constant 0 : i32
    %c0_i32_0 = arith.constant 0 : i32
    %c0_i32_1 = arith.constant 0 : i32
    return %arg1, %c0_i32, %c0_i32_0 : i32, i32, i32
  }
  func.func @transform_14(%arg0: i32, %arg1: i32) -> (i32, i32) {
    %c0_i32 = arith.constant 0 : i32
    %c0_i32_0 = arith.constant 0 : i32
    %c0_i32_1 = arith.constant 0 : i32
    return %c0_i32, %c0_i32_0 : i32, i32
  }
  func.func @transform_15(%arg0: i32, %arg1: i32) -> (i32, i32) {
    %c0_i32 = arith.constant 0 : i32
    %c0_i32_0 = arith.constant 0 : i32
    %c0_i32_1 = arith.constant 0 : i32
    return %c0_i32, %c0_i32_0 : i32, i32
  }
  func.func @transform_16(%arg0: i32, %arg1: i32) -> (i32, i32, i32) {
    %c0_i32 = arith.constant 0 : i32
    %c0_i32_0 = arith.constant 0 : i32
    %c0_i32_1 = arith.constant 0 : i32
    return %arg0, %c0_i32, %c0_i32_0 : i32, i32, i32
  }
}

</mosaic_0001>

<bundles_post_ra>
// kernel: tpu_custom_call.1
= control target key start
LH: loop header
LB: loop body
LE: loop exit
PB: predicated region body
PF: predicated region fallthrough
CT: control target
= control target key end

     0   :  { %s4012_s0 = inlined_call_operand.hbm [shape: f32[4,8,32], index: 0, kind: input, shape index: {}]   ;;  %s4013_s1 = inlined_call_operand.vmem [shape: f32[4,8,1], index: 1, kind: input, shape index: {}]   ;;  %s4014_s2 = inlined_call_operand.vmem [shape: f32[2,1,32], index: 2, kind: input, shape index: {}]   ;;  %s4015_s3 = inlined_call_operand.vmem [shape: f32[2,1,32], index: 3, kind: input, shape index: {}]   ;;  %s4016_s4 = inlined_call_operand.hbm [shape: f32[2,32,96], index: 4, kind: input, shape index: {}]   ;;  %s4017_s5 = inlined_call_operand.vmem [shape: f32[2,1,96], index: 5, kind: input, shape index: {}]   ;;  %s4018_s6 = inlined_call_operand.hbm [shape: f32[2,32,32], index: 6, kind: input, shape index: {}]   ;;  %s4019_s7 = inlined_call_operand.vmem [shape: f32[2,1,32], index: 7, kind: input, shape index: {}]   ;;  %s4020_s8 = inlined_call_operand.hbm [shape: f32[2,1,32], index: 8, kind: input, shape index: {}]   ;;  %s4021_s9 = inlined_call_operand.hbm [shape: f32[2,1,32], index: 9, kind: input, shape index: {}]   ;;  %s4022_s10 = inlined_call_operand.vmem [shape: f32[2,32,32], index: 10, kind: input, shape index: {}]   ;;  %s4023_s11 = inlined_call_operand.vmem [shape: f32[2,1,32], index: 11, kind: input, shape index: {}]   ;;  %s4024_s12 = inlined_call_operand.hbm [shape: f32[2,32,32], index: 12, kind: input, shape index: {}]   ;;  %s4025_s13 = inlined_call_operand.vmem [shape: f32[2,1,32], index: 13, kind: input, shape index: {}]   ;;  %s4026_s14 = inlined_call_operand.vmem [shape: f32[1,32], index: 14, kind: input, shape index: {}]   ;;  %s4027_s15 = inlined_call_operand.vmem [shape: f32[1,32], index: 15, kind: input, shape index: {}]   ;;  %s4028_s16 = inlined_call_operand.hbm [shape: f32[4,8,32], index: 16, kind: output, shape index: {}]  }
   0x1   :  { %4061 = sst [smem:[#allocation37_spill]] %s4012_s0 }
   0x2   :  { %4062 = sst [smem:[#allocation38_spill]] %s4013_s1 }
   0x3   :  { %4063 = sst [smem:[#allocation39_spill]] %s4014_s2 }
   0x4   :  { %4064 = sst [smem:[#allocation40_spill]] %s4015_s3 }
   0x5   :  { %4065 = sst [smem:[#allocation41_spill]] %s4016_s4 }
   0x6   :  { %4066 = sst [smem:[#allocation42_spill]] %s4017_s5 }
   0x7   :  { %4067 = sst [smem:[#allocation43_spill]] %s4018_s6 }
   0x8   :  { %4068 = sst [smem:[#allocation44_spill]] %s4019_s7 }
   0x9   :  { %4069 = sst [smem:[#allocation45_spill]] %s4020_s8 }
   0xa   :  { %4070 = sst [smem:[#allocation46_spill]] %s4021_s9 }
   0xb   :  { %4071 = sst [smem:[#allocation47_spill]] %s4022_s10 }
   0xc   :  { %4072 = sst [smem:[#allocation48_spill]] %s4023_s11 }
   0xd   :  { %4073 = sst [smem:[#allocation49_spill]] %s4024_s12 }
   0xe   :  { %4074 = sst [smem:[#allocation50_spill]] %s4025_s13 }
   0xf   :  { %4075 = sst [smem:[#allocation51_spill]] %s4026_s14 }
  0x10   :  { %4076 = sst [smem:[#allocation52_spill]] %s4027_s15 }
  0x11   :  { %4077 = sst [smem:[#allocation53_spill]] %s4028_s16 }
  0x12   :  { %21 = vsyncpa [#allocation5], 0 }
  0x13   :  { %23 = vsyncpa [#allocation5 + $0x1], 0 }
  0x14   :  { %24 = vsyncpa [#allocation8], 0 }
  0x15   :  { %26 = vsyncpa [#allocation8 + $0x1], 0 }
  0x16   :  { %27 = vsyncpa [#allocation11], 0 }
  0x17   :  { %29 = vsyncpa [#allocation11 + $0x1], 0 }
  0x18   :  { %30 = vsyncpa [#allocation14], 0 }
  0x19   :  { %32 = vsyncpa [#allocation14 + $0x1], 0 }
  0x1a   :  { %33 = vsyncpa [#allocation6], 0 }
  0x1b   :  { %35 = vsyncpa [#allocation6 + $0x1], 0  ;;  %s3319_s21 = smov 0   ;;  %s3321_s22 = smov 0  }
  0x1c   :  { %s3323_s23 = smov 0   ;;  %s3325_s24 = smov 0  }
  0x1d   :  { %s3327_s25 = smov 0   ;;  %s3329_s26 = smov 0  }
  0x1e   :  { %s3331_s27 = smov 0   ;;  %s3333_s28 = smov 0  }
  0x1f   :  { %s3335_s29 = smov 0   ;;  %s3337_s30 = smov 0  }
  0x20   :  { %s3339_s0 = smov 0  }
  0x21 LB: > { %4078 = sst [smem:[#allocation21_spill]] %s3178_s22  ;;  %s50_s17 = sadd.s32 1, %s3206_s29  ;;  %s3214_s0 = sphi %s3339_s0, %s41_s0   ;;  %s3210_s30 = sphi %s3337_s30, %s4167_s30   ;;  %s3206_s29 = sphi %s3335_s29, %s4166_s29   ;;  %s3202_s28 = sphi %s3333_s28, %s4165_s28   ;;  %s3198_s27 = sphi %s3331_s27, %s4164_s27   ;;  %s3194_s26 = sphi %s3329_s26, %s4163_s26   ;;  %s3190_s25 = sphi %s3327_s25, %s4162_s25   ;;  %s3186_s24 = sphi %s3325_s24, %s4161_s24   ;;  %s3182_s23 = sphi %s3323_s23, %s4160_s23   ;;  %s3178_s22 = sphi %s3321_s22, %s4159_s22   ;;  %s3174_s21 = sphi %s3319_s21, %s4158_s21  }
  0x22   : > { %4079 = sst [smem:[#allocation22_spill]] %s3182_s23  ;;  %p4034_p0 = scmp.eq.s32.totalorder %s3214_s0, 0 }
  0x23   : > { %4080 = sst [smem:[#allocation23_spill]] %s3186_s24  ;;  %p3376_p1 = scmp.ge.s32.totalorder %s50_s17, 2 }
  0x24   : > { %4081 = sst [smem:[#allocation24_spill]] %s3190_s25  ;;  %s164_s19 = sadd.s32 1, %s3182_s23 }
  0x25   : > { %4082 = sst [smem:[#allocation25_spill]] %s3194_s26  ;;  %p171_p2 = scmp.ne.s32.totalorder %s3182_s23, %s3178_s22 }
  0x26   : > { %4083 = sst [smem:[#allocation26_spill]] %s3198_s27  ;;  %s4169_s17 = smov (%p3376_p1, %s50_s17), 0 }
  0x27   : > { %4084 = sst [smem:[#allocation27_spill]] %s3202_s28  ;;  %p173_p4 = por %p171_p2, %p4034_p0 }
  0x28   : > { %4085 = sst [smem:[#allocation28_spill]] %s3206_s29  ;;  %s161_s20 = ssub.s32 %s3206_s29, %s4169_s17 }
  0x29   : > { %4086 = sst [smem:[#allocation29_spill]] %s3210_s30  ;;  %p4033_p5 = scmp.lt.s32.totalorder %s3214_s0, 4 }
  0x2a   : > { %s4087_s18 = scalar_select %p3376_p1, 1, 0 }
  0x2b   : > { %4088 = sst [smem:[#allocation30_spill]] %s4169_s17  ;;  %p162_p6 = scmp.eq.s32.totalorder %s161_s20, 0 }
  0x2c   : > { %s3399_s14 = sand.u32 1, %s3182_s23   ;;  %s3405_s11 = sshll.u32 %s3206_s29, 9 }
  0x2d   : > { %s3396_s15 = scalar_select %p162_p6, %s3182_s23, %s164_s19  }
  0x2e   : > { %s3402_s13 = sshll.u32 %s3399_s14, 5  ;;  %s4090_s4 = sld [smem:[#allocation41_spill]] }
  0x2f   : > { %4089 = sst [smem:[#allocation31_spill]] %s3396_s15  ;;  %s555_s20 = scalar_lea.vmem [#allocation7], %s3402_s13 }
  0x30   : > { %s562_s19 = sshll.u32 %s555_s20, 4  ;;  %p3416_p7 = pnand %p4033_p5, %p173_p4  ;;  %s3420_s19 = int_to_ptr.vmem [resolvable:$true] %s562_s19 }
  0x31   : > { %s4092_s17 = sand.u32 1, %s3214_s0  }
  0x32   : > { %s4091_s16 = scalar_select %p3416_p7, 1, 0 }
  0x33   : > { %s3426_s7 = scalar_lea.sflag [#allocation8], %s4092_s17  ;;  %p3432_p11 = pneg %p3416_p7 }
  0x34   : > { %s3411_s5 = scalar_lea.hbm %s4090_s4, %s3405_s11  ;;  %s2905_s3 = scalar_lea.hbm %s4090_s4, 1024 }
  0x35   : > { %s2900_s10 = scalar_lea.hbm %s3411_s5, 512  ;;  %p2906_p2 = scmp.lt.u32.totalorder %s3411_s5, %s4090_s4 }
  0x36   : > { %p2901_p10 = scmp.ne.s32.totalorder %s3411_s5, %s2900_s10  ;;  %p2907_p4 = scmp.lt.u32.totalorder %s2905_s3, %s2900_s10 }
  0x37   : > { %p2909_p5 = scmp.lt.u32.totalorder %s2900_s10, %s3411_s5 }
  0x38   : > { %p2903_p12 = pnand %p3432_p11, %p2901_p10  ;;  %p2908_p6 = por %p2907_p4, %p2906_p2 }
  0x3a   : > { %p2904_p13 = pneg %p2903_p12  ;;  %p2910_p3 = por %p2909_p5, %p2908_p6 }
  0x3c   : > { %p2911_p0 = pnand %p2910_p3, %p2904_p13 }
  0x3e   : > { %2914 = shalt.err (!%p2911_p0)
}
  0x3f   : > { %s2915_s17 = scalar_lea.vmem %s3420_s19, 512  ;;  %s3216_s23 = smov [#allocation7]  }
  0x40   : > { %p2916_p10 = scmp.ne.s32.totalorder %s3420_s19, %s2915_s17  ;;  %s2920_s20 = sshll.u32 %s3216_s23, 4  ;;  %s2921_s20 = int_to_ptr.vmem [resolvable:$false] %s2920_s20 }
  0x41   : > { %s2922_s1 = scalar_lea.vmem %s2921_s20, 1024  ;;  %p2923_p9 = scmp.lt.s32.totalorder %s3420_s19, %s2921_s20 }
  0x42   : > { %p2918_p12 = pnand %p2916_p10, %p3432_p11  ;;  %p2924_p1 = scmp.lt.s32.totalorder %s2922_s1, %s2915_s17 }
  0x44   : > { %p2919_p8 = pneg %p2918_p12  ;;  %p2925_p2 = por %p2924_p1, %p2923_p9 }
  0x46   : > { %p2926_p4 = pnand %p2925_p2, %p2919_p8 }
  0x48   : > { %2929 = shalt.err (!%p2926_p4)
}
  0x49   : > { %s4037_s2 = smov 128   ;;  %s4039_s3 = smov 8  }
  0x4a   : > { %2741 = dma.hbm_to_vmem [thread:$0]  (!%p3416_p7), %s3411_s5, 512, %s3420_s19, %s3426_s7, %s4037_s2, %s4037_s2, %s4039_s3  }
  0x4b   : > { %p4094_p0 = scmp.lt.s32.totalorder %s3214_s0, 5  ;;  %p4095_p1 = scmp.ge.s32.totalorder %s3214_s0, 1 }
  0x4c   : > { %s2480_s17 = sshll.u32 %s3206_s29, 4  ;;  %s4098_s8 = sld [smem:[#allocation45_spill]] }
  0x4d   : > { %p3463_p3 = pnand %p4095_p1, %p4094_p0  ;;  %s608_s4 = scalar_lea.vmem [#allocation10], %s3399_s14 }
  0x4e   : > { %s615_s27 = sshll.u32 %s608_s4, 4  ;;  %s4099_s9 = sld [smem:[#allocation46_spill]]  ;;  %s3474_s27 = int_to_ptr.vmem [resolvable:$true] %s615_s27 }
  0x4f   : > { %s4096_s10 = scalar_select %p3463_p3, 1, 0 }
  0x50   : > { %s4100_s3 = sand.u32 1, %s3214_s0  }
  0x51   : > { %4097 = sst [smem:[#allocation32_spill]] %s4096_s10  ;;  %s3483_s29 = scalar_lea.sflag [#allocation11], %s4100_s3 }
  0x52   : > { %s3471_s1 = scalar_lea.hbm %s4098_s8, %s2480_s17  ;;  %s2935_s10 = scalar_lea.hbm %s4098_s8, 32 }
  0x53   : > { %s2930_s28 = scalar_lea.hbm %s3471_s1, 16  ;;  %p2936_p13 = scmp.lt.u32.totalorder %s3471_s1, %s4098_s8 }
  0x54   : > { %s3479_s2 = scalar_lea.hbm %s4099_s9, %s2480_s17  ;;  %p2931_p5 = scmp.ne.s32.totalorder %s3471_s1, %s2930_s28 }
  0x55   : > { %p2937_p6 = scmp.lt.u32.totalorder %s2935_s10, %s2930_s28  ;;  %p2939_p12 = scmp.lt.u32.totalorder %s2930_s28, %s3471_s1 }
  0x56   : > { %p2933_p8 = pnand %p2931_p5, %p3432_p11 }
  0x57   : > { %p2938_p10 = por %p2937_p6, %p2936_p13 }
  0x58   : > { %p2934_p9 = pneg %p2933_p8 }
  0x59   : > { %p2940_p2 = por %p2939_p12, %p2938_p10 }
  0x5b   : > { %p2941_p4 = pnand %p2940_p2, %p2934_p9 }
  0x5d   : > { %2944 = shalt.err (!%p2941_p4)
}
  0x5e   : > { %s2945_s3 = scalar_lea.vmem %s3474_s27, 16  ;;  %s3219_s17 = smov [#allocation10]  }
  0x5f   : > { %p2946_p0 = scmp.ne.s32.totalorder %s3474_s27, %s2945_s3  ;;  %s2950_s5 = sshll.u32 %s3219_s17, 4  ;;  %s2951_s5 = int_to_ptr.vmem [resolvable:$false] %s2950_s5 }
  0x60   : > { %s2952_s12 = scalar_lea.vmem %s2951_s5, 32  ;;  %p2953_p8 = scmp.lt.s32.totalorder %s3474_s27, %s2951_s5 }
  0x61   : > { %p2948_p1 = pnand %p2946_p0, %p3432_p11  ;;  %p2954_p3 = scmp.lt.s32.totalorder %s2952_s12, %s2945_s3 }
  0x63   : > { %p2949_p5 = pneg %p2948_p1  ;;  %p2955_p13 = por %p2954_p3, %p2953_p8 }
  0x65   : > { %p2956_p6 = pnand %p2955_p13, %p2949_p5 }
  0x67   : > { %2959 = shalt.err (!%p2956_p6)
}
  0x68   : > { %2747 = dma.hbm_to_vmem [thread:$0]  (!%p3416_p7), %s3471_s1, 16, %s3474_s27, %s3483_s29  }
  0x69   : > { %s3508_s28 = sadd.s32 4294967295, %s3214_s0   ;;  %s2468_s10 = sadd.s32 4294967294, %s3214_s0  }
  0x6a   : > { %s53_s19 = sadd.s32 1, %s3210_s30  ;;  %s60_s23 = sadd.s32 1, %s3194_s26 }
  0x6b   : > { %p4101_p3 = scmp.ne.s32.totalorder %s4087_s18, 0  ;;  %p67_p9 = scmp.ne.s32.totalorder %s3194_s26, %s3190_s25 }
  0x6c   : > { %p73_p10 = scmp.ne.s32.totalorder %s3190_s25, %s3186_s24  ;;  %p74_p2 = scmp.eq.s32.totalorder %s3508_s28, 0 }
  0x6d   : > { %s4171_s19 = smov (!%p4101_p3, %s53_s19), %s3210_s30  ;;  %p4102_p4 = scmp.eq.s32.totalorder %s3214_s0, 0 }
  0x6e   : > { %p55_p12 = scmp.ge.s32.totalorder %s4171_s19, 2  ;;  %p477_p1 = scmp.eq.s32.totalorder %s3508_s28, 3 }
  0x6f   : > { %p3523_p0 = por %p4102_p4, %p67_p9  ;;  %p3533_p5 = por %p74_p2, %p73_p10 }
  0x70   : > { %s4173_s19 = smov (%p55_p12, %s4171_s19), 0  ;;  %p4106_p8 = scmp.ne.s32.totalorder %s3178_s22, %s3174_s21 }
  0x71   : > { %4104 = sst [smem:[#allocation33_spill]] %s4173_s19  ;;  %s57_s20 = ssub.s32 %s3210_s30, %s4173_s19 }
  0x72   : > { %s4105_s18 = scalar_select %p3533_p5, 1, 0 }
  0x73   : > { %p3540_p13 = por %p4106_p8, %p74_p2  ;;  %p3546_p6 = por %p477_p1, %p67_p9 }
  0x74   : > { %p58_p3 = scmp.eq.s32.totalorder %s57_s20, 0  ;;  %p483_p4 = scmp.eq.s32.totalorder %s2468_s10, 3 }
  0x75   : > { %s4107_s1 = scalar_select %p3540_p13, 1, 0 }
  0x76   : > { %s4109_s4 = scalar_select %p3546_p6, 1, 0 }
  0x77   : > { %4108 = sst [smem:[#allocation34_spill]] %s4107_s1  ;;  %s509_s3 = sand.u32 1, %s3194_s26  }
  0x78   : > { %s2534_s17 = sshll.u32 %s3210_s30, 8  ;;  %p3558_p12 = por %p483_p4, %p73_p10 }
  0x79   : > { %s3553_s5 = scalar_select %p58_p3, %s3194_s26, %s60_s23  }
  0x7a   : > { %s4111_s12 = scalar_select %p3558_p12, 1, 0 }
  0x7b   : > { %4110 = sst [smem:[#allocation35_spill]] %s3553_s5  ;;  %s2471_s21 = sshll.u32 %s509_s3, 4 }
  0x7c   : > { %4112 = sst [smem:[#allocation36_spill]] %s4111_s12  ;;  %p4114_p9 = scmp.lt.s32.totalorder %s3214_s0, 4 }
  0x7d   : > { %s4113_s1 = sld [smem:[#allocation37_spill]]  ;;  %s513_s23 = scalar_lea.vmem [#allocation4], %s2471_s21 }
  0x7e   : > { %p3571_p2 = pnand %p4114_p9, %p3523_p0  ;;  %s520_s20 = sshll.u32 %s513_s23, 4  ;;  %s3575_s20 = int_to_ptr.vmem [resolvable:$true] %s520_s20 }
  0x7f   : > { %s3577_s30 = scalar_lea.sflag [#allocation5], %s509_s3 }
  0x80   : > { %p2962_p1 = pneg %p3571_p2 }
  0x83   : > { %s3565_s19 = scalar_lea.hbm %s4113_s1, %s2534_s17  ;;  %s2965_s17 = scalar_lea.hbm %s4113_s1, 512 }
  0x84   : > { %s2960_s8 = scalar_lea.hbm %s3565_s19, 256  ;;  %p2966_p0 = scmp.lt.u32.totalorder %s3565_s19, %s4113_s1 }
  0x85   : > { %p2961_p10 = scmp.ne.s32.totalorder %s3565_s19, %s2960_s8  ;;  %p2967_p4 = scmp.lt.u32.totalorder %s2965_s17, %s2960_s8 }
  0x86   : > { %p2969_p12 = scmp.lt.u32.totalorder %s2960_s8, %s3565_s19 }
  0x87   : > { %p2963_p8 = pnand %p2962_p1, %p2961_p10  ;;  %p2968_p9 = por %p2967_p4, %p2966_p0 }
  0x89   : > { %p2964_p3 = pneg %p2963_p8  ;;  %p2970_p6 = por %p2969_p12, %p2968_p9 }
  0x8b   : > { %p2971_p13 = pnand %p2970_p6, %p2964_p3 }
  0x8d   : > { %2974 = shalt.err (!%p2971_p13)
}
  0x8e   : > { %s2975_s3 = scalar_lea.vmem %s3575_s20, 256  ;;  %s3220_s21 = smov [#allocation4]  }
  0x8f   : > { %p2976_p10 = scmp.ne.s32.totalorder %s3575_s20, %s2975_s3  ;;  %s2980_s23 = sshll.u32 %s3220_s21, 4  ;;  %s2981_s23 = int_to_ptr.vmem [resolvable:$false] %s2980_s23 }
  0x90   : > { %s2982_s26 = scalar_lea.vmem %s2981_s23, 512  ;;  %p2983_p7 = scmp.lt.s32.totalorder %s3575_s20, %s2981_s23 }
  0x91   : > { %p2978_p8 = pnand %p2976_p10, %p2962_p1  ;;  %p2984_p0 = scmp.lt.s32.totalorder %s2982_s26, %s2975_s3 }
  0x93   : > { %p2979_p5 = pneg %p2978_p8  ;;  %p2985_p4 = por %p2984_p0, %p2983_p7 }
  0x95   : > { %p2986_p12 = pnand %p2985_p4, %p2979_p5 }
  0x97   : > { %2989 = shalt.err (!%p2986_p12)
}
  0x98   : > { %s4116_s5 = smov 8   ;;  %s4117_s8 = smov 128  }
  0x99   : > { %2738 = dma.hbm_to_vmem [thread:$0]  (!%p3571_p2), %s3565_s19, 256, %s3575_s20, %s3577_s30, %s4117_s8, %s4117_s8, %s4116_s5  }
  0x9a   : > { %s4118_s6 = sld [smem:[#allocation43_spill]]  ;;  %s582_s10 = scalar_lea.vmem [#allocation9], %s3402_s13 }
  0x9b   : > { %s589_s3 = sshll.u32 %s582_s10, 4  ;;  %s3615_s3 = int_to_ptr.vmem [resolvable:$true] %s589_s3 }
  0xa0   : > { %s3612_s17 = scalar_lea.hbm %s4118_s6, %s3405_s11  ;;  %s2995_s19 = scalar_lea.hbm %s4118_s6, 1024 }
  0xa1   : > { %s2990_s21 = scalar_lea.hbm %s3612_s17, 512  ;;  %p2996_p6 = scmp.lt.u32.totalorder %s3612_s17, %s4118_s6 }
  0xa2   : > { %p2991_p7 = scmp.ne.s32.totalorder %s3612_s17, %s2990_s21  ;;  %p2997_p2 = scmp.lt.u32.totalorder %s2995_s19, %s2990_s21 }
  0xa3   : > { %p2999_p3 = scmp.lt.u32.totalorder %s2990_s21, %s3612_s17 }
  0xa4   : > { %p2993_p5 = pnand %p2991_p7, %p3432_p11  ;;  %p2998_p1 = por %p2997_p2, %p2996_p6 }
  0xa6   : > { %p2994_p13 = pneg %p2993_p5  ;;  %p3000_p9 = por %p2999_p3, %p2998_p1 }
  0xa8   : > { %p3001_p10 = pnand %p3000_p9, %p2994_p13 }
  0xaa   : > { %3004 = shalt.err (!%p3001_p10)
}
  0xab   : > { %s3005_s22 = scalar_lea.vmem %s3615_s3, 512  ;;  %s3221_s27 = smov [#allocation9]  }
  0xac   : > { %p3006_p8 = scmp.ne.s32.totalorder %s3615_s3, %s3005_s22  ;;  %s3010_s10 = sshll.u32 %s3221_s27, 4  ;;  %s3011_s10 = int_to_ptr.vmem [resolvable:$false] %s3010_s10 }
  0xad   : > { %s3012_s23 = scalar_lea.vmem %s3011_s10, 1024  ;;  %p3013_p12 = scmp.lt.s32.totalorder %s3615_s3, %s3011_s10 }
  0xae   : > { %p3008_p0 = pnand %p3006_p8, %p3432_p11  ;;  %p3014_p7 = scmp.lt.s32.totalorder %s3012_s23, %s3005_s22 }
  0xb0   : > { %p3009_p4 = pneg %p3008_p0  ;;  %p3015_p5 = por %p3014_p7, %p3013_p12 }
  0xb2   : > { %p3016_p6 = pnand %p3015_p5, %p3009_p4 }
  0xb4   : > { %3019 = shalt.err (!%p3016_p6)
}
  0xb5   : > { %p4119_p13 = scmp.ne.s32.totalorder %s4091_s16, 0  ;;  %s625_s21 = scalar_lea.vmem [#allocation12], %s3399_s14 }
  0xb6   : > { %s632_s30 = sshll.u32 %s625_s21, 4  ;;  %s3020_s19 = scalar_lea.hbm %s3479_s2, 16  ;;  %s633_s30 = int_to_ptr.vmem [resolvable:$true] %s632_s30 }
  0xb7   : > { %2744 = dma.hbm_to_vmem [thread:$0]  (!%p4119_p13), %s3612_s17, 512, %s3615_s3, %s3426_s7, %s4117_s8, %s4117_s8, %s4116_s5  }
  0xb8   : > { %p3021_p2 = scmp.ne.s32.totalorder %s3479_s2, %s3020_s19  ;;  %s3025_s22 = scalar_lea.hbm %s4099_s9, 32 }
  0xb9   : > { %p3026_p9 = scmp.lt.u32.totalorder %s3479_s2, %s4099_s9  ;;  %p3027_p10 = scmp.lt.u32.totalorder %s3025_s22, %s3020_s19 }
  0xba   : > { %p3023_p1 = pnand %p3021_p2, %p3432_p11  ;;  %p3029_p0 = scmp.lt.u32.totalorder %s3020_s19, %s3479_s2 }
  0xbb   : > { %p3028_p8 = por %p3027_p10, %p3026_p9 }
  0xbc   : > { %p3024_p3 = pneg %p3023_p1 }
  0xbd   : > { %p3030_p4 = por %p3029_p0, %p3028_p8 }
  0xbf   : > { %p3031_p12 = pnand %p3030_p4, %p3024_p3 }
  0xc1   : > { %3034 = shalt.err (!%p3031_p12)
}
  0xc2   : > { %s3035_s7 = scalar_lea.vmem %s633_s30, 16  ;;  %s3222_s17 = smov [#allocation12]  }
  0xc3   : > { %p3036_p7 = scmp.ne.s32.totalorder %s633_s30, %s3035_s7  ;;  %s3040_s3 = sshll.u32 %s3222_s17, 4  ;;  %s3041_s3 = int_to_ptr.vmem [resolvable:$false] %s3040_s3 }
  0xc4   : > { %s3042_s23 = scalar_lea.vmem %s3041_s3, 32  ;;  %p3043_p2 = scmp.lt.s32.totalorder %s633_s30, %s3041_s3 }
  0xc5   : > { %p3038_p5 = pnand %p3036_p7, %p3432_p11  ;;  %p3044_p1 = scmp.lt.s32.totalorder %s3042_s23, %s3035_s7 }
  0xc7   : > { %p3039_p6 = pneg %p3038_p5  ;;  %p3045_p13 = por %p3044_p1, %p3043_p2 }
  0xc9   : > { %p3046_p9 = pnand %p3045_p13, %p3039_p6 }
  0xcb   : > { %3049 = shalt.err (!%p3046_p9)
}
  0xcc   : > { %p4120_p10 = scmp.ne.s32.totalorder %s4091_s16, 0  ;;  %s4121_s20 = sld [smem:[#allocation49_spill]] }
  0xcd   : > { %s657_s22 = scalar_lea.vmem [#allocation13], %s3402_s13  ;;  %s654_s10 = scalar_lea.sflag [#allocation14], %s3399_s14 }
  0xce   : > { %2750 = dma.hbm_to_vmem [thread:$0]  (!%p4120_p10), %s3479_s2, 16, %s633_s30, %s3483_s29  }
  0xcf   : > { %s664_s27 = sshll.u32 %s657_s22, 4  ;;  %s3668_s27 = int_to_ptr.vmem [resolvable:$true] %s664_s27 }
  0xd2   : > { %s3665_s26 = scalar_lea.hbm %s4121_s20, %s3405_s11  ;;  %s3055_s30 = scalar_lea.hbm %s4121_s20, 1024 }
  0xd3   : > { %s3050_s7 = scalar_lea.hbm %s3665_s26, 512  ;;  %p3056_p0 = scmp.lt.u32.totalorder %s3665_s26, %s4121_s20 }
  0xd4   : > { %p3051_p13 = scmp.ne.s32.totalorder %s3665_s26, %s3050_s7  ;;  %p3057_p4 = scmp.lt.u32.totalorder %s3055_s30, %s3050_s7 }
  0xd5   : > { %p3059_p7 = scmp.lt.u32.totalorder %s3050_s7, %s3665_s26 }
  0xd6   : > { %p3053_p3 = pnand %p3051_p13, %p3432_p11  ;;  %p3058_p12 = por %p3057_p4, %p3056_p0 }
  0xd8   : > { %p3054_p8 = pneg %p3053_p3  ;;  %p3060_p5 = por %p3059_p7, %p3058_p12 }
  0xda   : > { %p3061_p6 = pnand %p3060_p5, %p3054_p8 }
  0xdc   : > { %3064 = shalt.err (!%p3061_p6)
}
  0xdd   : > { %s3065_s13 = scalar_lea.vmem %s3668_s27, 512  ;;  %s3223_s3 = smov [#allocation13]  }
  0xde   : > { %p3066_p2 = scmp.ne.s32.totalorder %s3668_s27, %s3065_s13  ;;  %s3070_s23 = sshll.u32 %s3223_s3, 4  ;;  %s3071_s23 = int_to_ptr.vmem [resolvable:$false] %s3070_s23 }
  0xdf   : > { %s3072_s21 = scalar_lea.vmem %s3071_s23, 1024  ;;  %p3073_p13 = scmp.lt.s32.totalorder %s3668_s27, %s3071_s23 }
  0xe0   : > { %p3068_p1 = pnand %p3066_p2, %p3432_p11  ;;  %p3074_p3 = scmp.lt.s32.totalorder %s3072_s21, %s3065_s13 }
  0xe2   : > { %p3069_p9 = pneg %p3068_p1  ;;  %p3075_p0 = por %p3074_p3, %p3073_p13 }
  0xe4   : > { %p3076_p4 = pnand %p3075_p0, %p3069_p9 }
  0xe6   : > { %3079 = shalt.err (!%p3076_p4)
}
  0xe7   : > { %2753 = dma.hbm_to_vmem [thread:$0]  (!%p4120_p10), %s3665_s26, 512, %s3668_s27, %s654_s10, %s4117_s8, %s4117_s8, %s4116_s5  }
  0xe8   : > { %s4122_s15 = sld [smem:[#allocation32_spill]] }
  0xee   : > { %p4123_p11 = scmp.ne.s32.totalorder %s4122_s15, 0 }
  0xef   : > { %s3700_s19 = sand.u32 (!%p4123_p11), 1, %s3190_s25   ;;  %p4124_p8 = scmp.ne.s32.totalorder (!%p4123_p11), %s4105_s18, 0 }
  0xf0   : > { %682 = sbr.rel (%p4123_p11) target bundleno = 3242 (0xcaa), region = 84  ;;  %s4055_s22 = sshll.u32 (!%p4123_p11), %s3700_s19, 4 }
  0xf1   : > { %s685_s16 = scalar_lea.sflag (!%p4123_p11), [#allocation5], %s3700_s19  ;;  %s3706_s7 = scalar_lea.vmem (!%p4123_p11), [#allocation4], %s4055_s22 }
  0xf7   : > { %3153 = dma.done.wait (%p4124_p8), %s685_s16, 256  }
  0xf8   : > { %3155 = vsyncadd (%p4124_p8), %s685_s16, 4294967040  ;;  %s4125_s14 = sld [smem:[#allocation21_spill]]  ;;  %s4126_s5 = sld [smem:[#allocation34_spill]] }
  0xf9   : > { %s693_s8 = sand.u32 1, %s3508_s28  }
  0xfa   : > { %s694_s10 = scalar_lea.sflag [#allocation8], %s693_s8 }
  0xfe   : > { %s3714_s26 = sand.u32 1, %s4125_s14   ;;  %p4127_p10 = scmp.ne.s32.totalorder %s4126_s5, 0 }
  0xff   : > { %s2487_s27 = sshll.u32 %s3714_s26, 5 }
 0x100   : > { %s3717_s29 = scalar_lea.vmem [#allocation7], %s2487_s27 }
 0x101   : > { %3157 = dma.done.wait (%p4127_p10), %s694_s10, 1024  }
 0x102   : > { %3159 = vsyncadd (%p4127_p10), %s694_s10, 4294966272  ;;  %s3723_s18 = scalar_lea.vmem [#allocation9], %s2487_s27  ;;  %s712_s2 = scalar_lea.sflag [#allocation11], %s693_s8 }
 0x103   : > { %3161 = dma.done.wait (%p4127_p10), %s712_s2, 32  }
 0x104   : > { %3163 = vsyncadd (%p4127_p10), %s712_s2, 4294967264  ;;  %s728_s11 = scalar_lea.sflag [#allocation14], %s3714_s26  ;;  %s3732_s17 = scalar_lea.vmem [#allocation13], %s2487_s27 }
 0x105   : > { %3165 = dma.done.wait (%p4127_p10), %s728_s11, 512  }
 0x106   : > { %3167 = vsyncadd (%p4127_p10), %s728_s11, 4294966784  ;;  %s4128_s13 = sld [smem:[#allocation27_spill]]  ;;  %s4129_s3 = sld [smem:[#allocation26_spill]] }
 0x107   : > { %s4130_s5 = sld [smem:[#allocation38_spill]]  ;;  %s4133_s9 = sld [smem:[#allocation42_spill]] }
 0x108   : > { %s4134_s16 = sld [smem:[#allocation44_spill]]  ;;  %s4135_s10 = sld [smem:[#allocation47_spill]] }
 0x109   : > { %s4136_s12 = sld [smem:[#allocation48_spill]]  ;;  %s4138_s6 = sshll.u32 %s3700_s19, 4 }
 0x10c   : > { %s2491_s23 = sshll.u32 %s4128_s13, 1  ;;  %p838_p7 = scmp.lt.s32.totalorder %s4129_s3, 1 }
 0x10d   : > { %p833_p12 = scmp.lt.s32.totalorder %s2491_s23, 3  ;;  %s4137_s13 = sld [smem:[#allocation50_spill]] }
 0x10e   : > { %s3741_s21 = scalar_select %p838_p7, %s4129_s3, 1 }
 0x10f   : > { %s4175_s23 = smov (!%p833_p12, %s2491_s23), 3  ;;  %p2495_p5 = scmp.ne.s32.totalorder %s4129_s3, 0 }
 0x110   : > { %s2492_s15 = sshll.u32 %s4175_s23, 3  ;;  %s846_s23 = scalar_lea.vmem %s4133_s9, %s3741_s21  ;;  %v3224_v2 = vmov (!%p2495_p5), 0   ;;  %v868_v3 = vld [vmem:[%s3706_s7] sm:$0xff] (!%p2495_p5)  ;;  %vm882_vm0 = vcmask (!%p2495_p5), 261120   ;;  %v869_v6 = vld [vmem:[%s3706_s7 + $0x8] sm:$0xff] (!%p2495_p5) }
 0x111   : > { %s836_s8 = scalar_lea.vmem %s4130_s5, %s2492_s15  ;;  %s849_s15 = scalar_lea.vmem %s4134_s16, %s3741_s21  ;;  %2859 = vset.pattern.permute.xlu0 (!%p2495_p5), %v3224_v2 }
 0x112   : > { %v3750_v0 = vld [vmem:[%s836_s8] sm:$0xff]  ;;  %v3752_v1 = vld [vmem:[%s836_s8 + $0x8] sm:$0xff]  ;;  %s2538_s14 = sshll.u32 %s3741_s21, 5  ;;  %s857_s24 = scalar_lea.vmem %s4136_s12, %s3741_s21 }
 0x113   : > { %s3770_s2 = scalar_lea.vmem %s4135_s10, %s2538_s14  ;;  %s860_s22 = scalar_lea.vmem %s4137_s13, %s3741_s21  ;;  %872 = vperm.xlu0 (!%p2495_p5), %2859, %v3750_v0  }
 0x114   : > { %s3782_s9 = scalar_lea.vmem [#allocation15], %s4138_s6  ;;  %867 = sbr.rel (%p2495_p5) target bundleno = 410 (0x19a), region = 112 }
 0x117   : > { %877 = vperm.xlu0 (!%p2495_p5), %2859, %v3752_v1  }
 0x192   : > { %v873_v4 = vpop.permute.xlu0 %872 }
 0x193   : > { %v880_v5 = vmul.f32 %v873_v4, %v868_v3 }
 0x195   : > { %883 = vst.msk [vmem:[#allocation2] sm:$0xff] %vm882_vm0, %v880_v5 }
 0x196   : > { %v878_v7 = vpop.permute.xlu0 %877 }
 0x197   : > { %v881_v8 = vmul.f32 %v878_v7, %v869_v6 }
 0x199   : > { %884 = vst.msk [vmem:[#allocation2 + $0x8] sm:$0xff] %vm882_vm0, %v881_v8 }
 0x19a PF: > { %vm894_vm1 = vcmask 261120   ;;  %v887_v13 = vld [vmem:[%s3717_s29] sm:$0xff]  ;;  %v888_v14 = vld [vmem:[%s3717_s29 + $0x8] sm:$0xff]  ;;  %s3225_s25 = smov 96   ;;  %v889_v26 = vld [vmem:[%s3717_s29 + $0x10] sm:$0xff]  ;;  %s4140_s3 = sld [smem:[#allocation39_spill]] }
 0x19b   : > { %v2860_v15 = vpack.i.bf16 %v888_v14, %v887_v13  ;;  %v890_v27 = vld [vmem:[%s3717_s29 + $0x18] sm:$0xff]  ;;  %v2681_v33 = vpack.c.bf16 %v888_v14, %v887_v13  ;;  %v2498_v35 = vld [vmem:[%s846_s23] ss:$0 sm:$0xff]  ;;  %s4142_s14 = sld [smem:[#allocation40_spill]]  ;;  %v3226_v56 = vmov 0.0   ;;  %vm3227_vm2 = vmmov 0  }
 0x19c   : > { %v885_v9 = vld [vmem:[#allocation2] sm:$0xff]  ;;  %v2865_v28 = vpack.i.bf16 %v890_v27, %v889_v26  ;;  %v2685_v34 = vpack.c.bf16 %v890_v27, %v889_v26  ;;  %vm1137_vm3 = vcmask 130048   ;;  %s3228_s27 = smov 112   ;;  %vm1434_vm4 = vcmask 64512   ;;  %s3229_s10 = smov 16  }
 0x19d   : > { %v895_v11 = vsel %vm894_vm1, %v885_v9, 0.0  ;;  %2605 = vmatprep.mubr.msk.f32.mxu1 %vm894_vm1, %v885_v9  ;;  %2682 = vmatprep.subr.bf16.mxu0 %v2681_v33  ;;  %vm1793_vm5 = vcmask 261248  }
 0x19e   : > { %896 = vadd.xlane.f32.xlu0 %v895_v11  ;;  %2684 = vmatpush3.bf16.msra.mxu0 %v2681_v33 }
 0x19f   : > { %2686 = vmatprep.subr.bf16.mxu0 %v2685_v34 }
 0x1a0   : > { %v886_v10 = vld [vmem:[#allocation2 + $0x8] sm:$0xff]  ;;  %s4141_s11 = scalar_lea.vmem %s4140_s3, %s3741_s21 }
 0x1a1   : > { %v898_v12 = vsel %vm894_vm1, %v886_v10, 0.0  ;;  %v2496_v47 = vld [vmem:[%s4141_s11] ss:$0 sm:$0xff]  ;;  %s4143_s5 = scalar_lea.vmem %s4142_s14, %s3741_s21 }
 0x1a2   : > { %899 = vadd.xlane.f32.xlu0 %v898_v12  ;;  %2688 = vmatpush3.bf16.msra.mxu0 %v2685_v34  ;;  %v2497_v49 = vld [vmem:[%s4143_s5] ss:$0 sm:$0xff] }
 0x1a3   : > { %2618 = vmatprep.subr.mxu0 %v3226_v56 }
 0x1b8   : > { %2861 = vrot.lane.b32.xlu0 %v2860_v15, %s3225_s25 }
 0x22b   : > { %v897_v16 = vpop.xlane.xlu0 %896 }
 0x22c   : > { %v902_v17 = vmul.f32 0.03125, %v897_v16 }
 0x22e   : > { %v904_v18 = vsub.f32 %v885_v9, %v902_v17 }
 0x22f   : > { %v900_v19 = vpop.xlane.xlu0 %899 }
 0x230   : > { %v903_v20 = vmul.f32 0.03125, %v900_v19  ;;  %v906_v21 = vmul.f32 %v904_v18, %v904_v18 }
 0x232   : > { %v905_v22 = vsub.f32 %v886_v10, %v903_v20  ;;  %v908_v23 = vsel %vm894_vm1, %v906_v21, 0.0 }
 0x233   : > { %909 = vadd.xlane.f32.xlu1 %v908_v23  ;;  %v2862_v29 = vpop.permute.xlu0 %2861 }
 0x234   : > { %v907_v24 = vmul.f32 %v905_v22, %v905_v22  ;;  %v2864_v30 = vunpack.i.h.bf16 %v2862_v29  ;;  %v2863_v31 = vunpack.i.l.bf16 %v2862_v29 }
 0x236   : > { %v911_v25 = vsel %vm894_vm1, %v907_v24, 0.0  ;;  %v2689_v32 = vpack.c.bf16 %v2864_v30, %v2863_v31 }
 0x237   : > { %912 = vadd.xlane.f32.xlu1 %v911_v25 }
 0x238   : > { %2690 = vmatprep.subr.bf16.mxu1 %v2689_v32 }
 0x239   : > { %2692 = vmatpush3.bf16.msra.mxu1 %v2689_v32 }
 0x248   : > { %2866 = vrot.lane.b32.xlu1 %v2865_v28, %s3225_s25 }
 0x24c   : > { %1041 = vrot.lane.b32.xlu1 %v2498_v35, %s3225_s25 }
 0x2c0   : > { %v910_v36 = vpop.xlane.xlu1 %909 }
 0x2c1   : > { %v914_v37 = vmul.f32 0.03125, %v910_v36 }
 0x2c3   : > { %v916_v38 = vadd.f32 1e-08, %v914_v37 }
 0x2c4   : > { %v913_v39 = vpop.xlane.xlu1 %912 }
 0x2c5   : > { %2872 = vrsqrt.f32 %v916_v38  ;;  %v915_v40 = vmul.f32 0.03125, %v913_v39 }
 0x2c7   : > { %v917_v41 = vadd.f32 1e-08, %v915_v40 }
 0x2c8   : > { %v2867_v42 = vpop.permute.xlu1 %2866 }
 0x2c9   : > { %2874 = vrsqrt.f32 %v917_v41  ;;  %v2869_v43 = vunpack.i.h.bf16 %v2867_v42  ;;  %v2868_v44 = vunpack.i.l.bf16 %v2867_v42 }
 0x2cb   : > { %v2693_v45 = vpack.c.bf16 %v2869_v43, %v2868_v44 }
 0x2cc   : > { %v1042_v57 = vpop.permute.xlu1 %1041 }
 0x2cd   : > { %2694 = vmatprep.subr.bf16.mxu1 %v2693_v45 }
 0x2ce   : > { %2696 = vmatpush3.bf16.msra.mxu1 %v2693_v45 }
 0x2cf   : > { %v2873_v46 = vpop.eup %2872  ;;  %2608 = vmatprep.subr.mxu1 %v3226_v56 }
 0x2d0   : > { %v920_v48 = vmul.f32 %v2873_v46, %v904_v18 }
 0x2d1   : > { %2606 = vmatmul.mubr.msk.f32.vlgmr.msra.gmra.mrb[0].mxu1 %vm894_vm1, %v886_v10 }
 0x2d2   : > { %v928_v50 = vmul.f32 %v2496_v47, %v920_v48  ;;  %2610 = vmatprep.mubr.msk.f32.mxu1 %vm3227_vm2, %v3226_v56 }
 0x2d3   : > { %v2875_v51 = vpop.eup %2874 }
 0x2d4   : > { %v921_v52 = vmul.f32 %v2875_v51, %v905_v22  ;;  %v3817_v53 = vadd.f32 %v2497_v49, %v928_v50 }
 0x2d6   : > { %v929_v54 = vmul.f32 %v2496_v47, %v921_v52  ;;  %2594 = vmatprep.mubr.msk.f32.mxu0 %vm894_vm1, %v3817_v53 }
 0x2d8   : > { %v3821_v55 = vadd.f32 %v2497_v49, %v929_v54 }
 0x2da   : > { %2595 = vmatmul.mubr.msk.f32.vlgmr.msra.gmra.mrb[0].mxu0 %vm894_vm1, %v3821_v55 }
 0x2db   : > { %2620 = vmatprep.mubr.msk.f32.mxu0 %vm3227_vm2, %v3226_v56 }
 0x3a4   : > { %v2607_v58 = vpop.f32.mrb[0].mxu1 }
 0x3a5   : > { %v3831_v59 = vadd.f32 %v2607_v58, %v1042_v57  ;;  %v1116_v60 = vpop.f32.mrb[1].mxu1 }
 0x3a6   : > { %v1117_v61 = vadd.f32 %v1116_v60, %v1042_v57 }
 0x3a7   : > { %1135 = vrot.lane.b32.xlu0 %v3831_v59, %s3228_s27 }
 0x3a8   : > { %1133 = vrot.lane.b32.xlu1 %v1117_v61, %s3228_s27  ;;  %2609 = vmatpush3.xpose.msk.msra.mxu1 %vm1137_vm3, %v1117_v61 }
 0x3a9   : > { %2613 = vmatprep.subr.mxu1 %v3226_v56 }
 0x3ad   : > { %v2596_v62 = vpop.f32.mrb[0].mxu0 }
 0x3ae   : > { %v1022_v63 = vadd.f32 %v2596_v62, %v2498_v35  ;;  %v1016_v2 = vpop.f32.mrb[1].mxu0  ;;  %v1799_v62 = vld [vmem:[%s3723_s18 + $0x8] sm:$0xff] }
 0x3af   : > { %v1017_v3 = vadd.f32 %v2498_v35, %v1016_v2  ;;  %v1800_v2 = vld [vmem:[%s3723_s18 + $0x10] sm:$0xff] }
 0x3b0   : > { %1129 = vrot.lane.b32.xlu0 %v1022_v63, %s3228_s27 }
 0x3b1   : > { %1127 = vrot.lane.b32.xlu1 %v1017_v3, %s3228_s27  ;;  %2611 = vmatmul.mubr.msk.f32.vlgmr.msra.gmra.mrb[2].mxu1 %vm1137_vm3, %v1017_v3  ;;  %v1801_v3 = vld [vmem:[%s3723_s18 + $0x18] sm:$0xff] }
 0x3b2   : > { %2614 = vmatpush3.xpose.msk.msra.mxu1 %vm1137_vm3, %v3831_v59  ;;  %2615 = vmatprep.mubr.msk.f32.mxu1 %vm3227_vm2, %v3226_v56 }
 0x3b3   : > { %2623 = vmatprep.subr.mxu1 %v3226_v56 }
 0x3b5   : > { %2616 = vmatmul.mubr.msk.f32.vlgmr.msra.gmra.mrb[4].mxu1 %vm1137_vm3, %v1022_v63 }
 0x3b6   : > { %2625 = vmatprep.mubr.msk.f32.mxu1 %vm3227_vm2, %v3226_v56 }
 0x419   : > { %v1136_v4 = vpop.permute.xlu0 %1135 }
 0x41a   : > { %v1134_v5 = vpop.permute.xlu1 %1133  ;;  %2624 = vmatpush3.xpose.msk.msra.mxu1 %vm1137_vm3, %v1136_v4 }
 0x41b   : > { %2619 = vmatpush3.xpose.msk.msra.mxu0 %vm1137_vm3, %v1134_v5  ;;  %2633 = vmatprep.subr.mxu1 %v3226_v56 }
 0x41c   : > { %2628 = vmatprep.subr.mxu0 %v3226_v56 }
 0x422   : > { %v1130_v6 = vpop.permute.xlu0 %1129 }
 0x423   : > { %v1128_v7 = vpop.permute.xlu1 %1127  ;;  %2626 = vmatmul.mubr.msk.f32.vlgmr.msra.gmra.mrb[6].mxu1 %vm1137_vm3, %v1130_v6 }
 0x424   : > { %2621 = vmatmul.mubr.msk.f32.vlgmr.msra.gmra.mrb[2].mxu0 %vm1137_vm3, %v1128_v7  ;;  %2635 = vmatprep.mubr.msk.f32.mxu1 %vm3227_vm2, %v3226_v56 }
 0x425   : > { %2630 = vmatprep.mubr.msk.f32.mxu0 %vm3227_vm2, %v3226_v56 }
 0x484   : > { %v1208_v8 = vpop.f32.mrb[2].mxu1 }
 0x485   : > { %v2612_v9 = vpop.f32.mrb[3].mxu1  ;;  %v1435_v10 = vsel %vm1434_vm4, %v1208_v8, -inf }
 0x486   : > { %1436 = vmax.xlane.f32.xlu1 %v1435_v10 }
 0x488   : > { %v1282_v11 = vpop.f32.mrb[4].mxu1 }
 0x489   : > { %v2617_v12 = vpop.f32.mrb[5].mxu1  ;;  %v1438_v13 = vsel %vm1434_vm4, %v1282_v11, -inf }
 0x48a   : > { %1439 = vmax.xlane.f32.xlu0 %v1438_v13 }
 0x497   : > { %1479 = vrot.lane.b32.xlu1 %v1117_v61, %s3225_s25  ;;  %v1798_v61 = vld [vmem:[%s3723_s18] sm:$0xff] }
 0x498   : > { %v2697_v63 = vpack.c.bf16 %v1799_v62, %v1798_v61  ;;  %v3230_v62 = vmov 0  }
 0x499   : > { %2871 = vset.pattern.permute.xlu0 %v3230_v62  ;;  %2870 = vset.pattern.permute.xlu1 %v3230_v62 }
 0x4f6   : > { %v1430_v14 = vpop.f32.mrb[6].mxu1 }
 0x4f7   : > { %v1356_v15 = vpop.f32.mrb[2].mxu0  ;;  %v2627_v16 = vpop.f32.mrb[7].mxu1  ;;  %v1444_v19 = vsel %vm1434_vm4, %v1430_v14, -inf }
 0x4f8   : > { %v2622_v17 = vpop.f32.mrb[3].mxu0  ;;  %v1441_v18 = vsel %vm1434_vm4, %v1356_v15, -inf }
 0x4f9   : > { %1442 = vmax.xlane.f32.xlu0 %v1441_v18 }
 0x4fd   : > { %1445 = vmax.xlane.f32.xlu0 %v1444_v19 }
 0x513   : > { %v1437_v20 = vpop.xlane.xlu1 %1436 }
 0x514   : > { %v1447_v21 = vsub.f32 %v1208_v8, %v1437_v20 }
 0x516   : > { %v1451_v22 = vmul.f32 1.442695, %v1447_v21 }
 0x517   : > { %v1480_v23 = vpop.permute.xlu1 %1479  ;;  %v1440_v24 = vpop.xlane.xlu0 %1439 }
 0x518   : > { %2876 = vpow2.f32 %v1451_v22  ;;  %v1448_v25 = vsub.f32 %v1282_v11, %v1440_v24  ;;  %2629 = vmatpush3.msra.mxu0 %v1480_v23 }
 0x519   : > { %2638 = vmatprep.subr.mxu0 %v3226_v56 }
 0x51a   : > { %v1453_v26 = vmul.f32 1.442695, %v1448_v25 }
 0x51c   : > { %2878 = vpow2.f32 %v1453_v26 }
 0x522   : > { %v2877_v27 = vpop.eup %2876 }
 0x523   : > { %v1459_v28 = vsel %vm1434_vm4, %v2877_v27, 0.0 }
 0x524   : > { %1460 = vadd.xlane.f32.xlu1 %v1459_v28 }
 0x526   : > { %v2879_v29 = vpop.eup %2878 }
 0x527   : > { %v1462_v30 = vsel %vm1434_vm4, %v2879_v29, 0.0 }
 0x528   : > { %1463 = vadd.xlane.f32.xlu0 %v1462_v30 }
 0x535   : > { %1631 = vrot.lane.b32.xlu1 %v1134_v5, %s3225_s25 }
 0x586   : > { %v1443_v31 = vpop.xlane.xlu0 %1442 }
 0x587   : > { %v1449_v32 = vsub.f32 %v1356_v15, %v1443_v31  ;;  %v1936_v31 = vld [vmem:[%s3770_s2] sm:$0xff] }
 0x589   : > { %v1455_v33 = vmul.f32 1.442695, %v1449_v32  ;;  %v1937_v32 = vld [vmem:[%s3770_s2 + $0x8] sm:$0xff] }
 0x58a   : > { %v1446_v34 = vpop.xlane.xlu0 %1445 }
 0x58b   : > { %2880 = vpow2.f32 %v1455_v33  ;;  %v1450_v35 = vsub.f32 %v1430_v14, %v1446_v34  ;;  %v2515_v14 = vld [vmem:[%s849_s15] ss:$0 sm:$0xff]  ;;  %v2705_v33 = vpack.c.bf16 %v1937_v32, %v1936_v31  ;;  %v1938_v34 = vld [vmem:[%s3770_s2 + $0x10] sm:$0xff]  ;;  %s4145_s15 = scalar_lea.vmem [#allocation10], %s3714_s26 }
 0x58d   : > { %v1457_v36 = vmul.f32 1.442695, %v1450_v35  ;;  %v1939_v35 = vld [vmem:[%s3770_s2 + $0x18] sm:$0xff]  ;;  %s4146_s2 = scalar_lea.vmem [#allocation12], %s3714_s26 }
 0x58f   : > { %2882 = vpow2.f32 %v1457_v36  ;;  %v2709_v36 = vpack.c.bf16 %v1939_v35, %v1938_v34 }
 0x595   : > { %v2881_v37 = vpop.eup %2880 }
 0x596   : > { %v1465_v38 = vsel %vm1434_vm4, %v2881_v37, 0.0 }
 0x597   : > { %1466 = vadd.xlane.f32.xlu1 %v1465_v38  ;;  %v2031_v38 = vld [vmem:[%s3732_s17 + $0x8] sm:$0xff] }
 0x599   : > { %v2883_v39 = vpop.eup %2882 }
 0x59a   : > { %v1468_v40 = vsel %vm1434_vm4, %v2883_v39, 0.0 }
 0x59b   : > { %1469 = vadd.xlane.f32.xlu0 %v1468_v40 }
 0x5a8   : > { %1707 = vrot.lane.b32.xlu1 %v1136_v4, %s3225_s25  ;;  %v2701_v4 = vpack.c.bf16 %v1801_v3, %v1800_v2 }
 0x5b1   : > { %v1461_v41 = vpop.xlane.xlu1 %1460  ;;  %1555 = vrot.lane.b32.xlu0 %v3831_v59, %s3225_s25 }
 0x5b2   : > { %2884 = vrcp.f32 %v1461_v41 }
 0x5b5   : > { %v1632_v44 = vpop.permute.xlu1 %1631  ;;  %v1464_v45 = vpop.xlane.xlu0 %1463 }
 0x5b6   : > { %2886 = vrcp.f32 %v1464_v45 }
 0x5bc   : > { %v2885_v42 = vpop.eup %2884 }
 0x5bd   : > { %v1472_v43 = vmul.f32 %v2885_v42, %v2877_v27 }
 0x5bf   : > { %2631 = vmatmul.mubr.msk.f32.vlgmr.msra.gmra.mrb[4].mxu0 %vm1434_vm4, %v1472_v43 }
 0x5c0   : > { %2639 = vmatpush3.msra.mxu0 %v1632_v44  ;;  %2640 = vmatprep.mubr.msk.f32.mxu0 %vm3227_vm2, %v3226_v56  ;;  %v2887_v48 = vpop.eup %2886 }
 0x5c1   : > { %v1474_v49 = vmul.f32 %v2887_v48, %v2879_v29  ;;  %2698 = vmatprep.subr.bf16.mxu0 %v2697_v63 }
 0x624   : > { %v1467_v46 = vpop.xlane.xlu1 %1466 }
 0x625   : > { %2888 = vrcp.f32 %v1467_v46 }
 0x628   : > { %v1470_v47 = vpop.xlane.xlu0 %1469  ;;  %v1708_v51 = vpop.permute.xlu1 %1707 }
 0x629   : > { %2890 = vrcp.f32 %v1470_v47  ;;  %v2518_v47 = vld [vmem:[%s4145_s15] ss:$0 sm:$0xff] }
 0x62c   : > { %v1556_v50 = vpop.permute.xlu0 %1555 }
 0x62d   : > { %2634 = vmatpush3.msra.mxu1 %v1556_v50 }
 0x62e   : > { %2636 = vmatmul.mubr.msk.f32.vlgmr.msra.gmra.mrb[8].mxu1 %vm1434_vm4, %v1474_v49  ;;  %2643 = vmatprep.subr.mxu1 %v3226_v56  ;;  %v2519_v49 = vld [vmem:[%s4146_s2] ss:$0 sm:$0xff] }
 0x62f   : > { %v2889_v52 = vpop.eup %2888  ;;  %2644 = vmatpush3.msra.mxu1 %v1708_v51  ;;  %2645 = vmatprep.mubr.msk.f32.mxu1 %vm3227_vm2, %v3226_v56 }
 0x630   : > { %v1476_v54 = vmul.f32 %v2889_v52, %v2881_v37  ;;  %2706 = vmatprep.subr.bf16.mxu1 %v2705_v33  ;;  %v2030_v37 = vld [vmem:[%s3732_s17] sm:$0xff] }
 0x632   : > { %2641 = vmatmul.mubr.msk.f32.vlgmr.msra.gmra.mrb[6].mxu0 %vm1434_vm4, %v1476_v54 }
 0x633   : > { %v2891_v57 = vpop.eup %2890  ;;  %2700 = vmatpush3.bf16.msra.mxu0 %v2697_v63  ;;  %v2520_v63 = vld [vmem:[%s857_s24] ss:$0 sm:$0xff]  ;;  %s4149_s24 = sld [smem:[#allocation26_spill]] }
 0x634   : > { %v1478_v58 = vmul.f32 %v2891_v57, %v2883_v39  ;;  %2702 = vmatprep.subr.bf16.mxu0 %v2701_v4  ;;  %v2713_v39 = vpack.c.bf16 %v2031_v38, %v2030_v37 }
 0x636   : > { %2646 = vmatmul.mubr.msk.f32.vlgmr.msra.gmra.mrb[10].mxu1 %vm1434_vm4, %v1478_v58 }
 0x637   : > { %2704 = vmatpush3.bf16.msra.mxu0 %v2701_v4  ;;  %2708 = vmatpush3.bf16.msra.mxu1 %v2705_v33 }
 0x638   : > { %2710 = vmatprep.subr.bf16.mxu1 %v2709_v36  ;;  %2714 = vmatprep.subr.bf16.mxu0 %v2713_v39 }
 0x639   : > { %p2526_p6 = scmp.ne.s32.totalorder %s4149_s24, 1 }
 0x63a   : > { %s4150_s1 = sld [smem:[#allocation51_spill]] (!%p2526_p6)  ;;  %s4151_s7 = sld [smem:[#allocation52_spill]] (!%p2526_p6) }
 0x63b   : > { %2712 = vmatpush3.bf16.msra.mxu1 %v2709_v36 }
 0x640   : > { %v2527_v33 = vld [vmem:[%s4150_s1] ss:$0 sm:$0xff] (!%p2526_p6) }
 0x641   : > { %v2528_v35 = vld [vmem:[%s4151_s7] ss:$0 sm:$0xff] (!%p2526_p6) }
 0x692   : > { %v1551_v59 = vpop.f32.mrb[4].mxu0 }
 0x693   : > { %1783 = vst.msk [vmem:[#allocation3] sm:$0xff] %vm1137_vm3, %v1551_v59  ;;  %v2632_v60 = vpop.f32.mrb[5].mxu0  ;;  %v2032_v59 = vld [vmem:[%s3732_s17 + $0x10] sm:$0xff] }
 0x694   : > { %v2033_v60 = vld [vmem:[%s3732_s17 + $0x18] sm:$0xff] }
 0x695   : > { %v2717_v61 = vpack.c.bf16 %v2033_v60, %v2032_v59 }
 0x701   : > { %v1627_v56 = vpop.f32.mrb[8].mxu1 }
 0x702   : > { %1784 = vst.msk [vmem:[#allocation3 + $0x8] sm:$0xff] %vm1137_vm3, %v1627_v56  ;;  %v2637_v5 = vpop.f32.mrb[9].mxu1 }
 0x705   : > { %v1703_v6 = vpop.f32.mrb[6].mxu0 }
 0x706   : > { %1787 = vrot.lane.b32.xlu1 %v1703_v6, %s3229_s10  ;;  %v2642_v7 = vpop.f32.mrb[7].mxu0 }
 0x709   : > { %v1779_v8 = vpop.f32.mrb[10].mxu1 }
 0x70a   : > { %1789 = vrot.lane.b32.xlu0 %v1779_v8, %s3229_s10  ;;  %v2647_v9 = vpop.f32.mrb[11].mxu1 }
 0x778   : > { %v1788_v10 = vpop.permute.xlu1 %1787 }
 0x779   : > { %1794 = vst.msk [vmem:[#allocation3] sm:$0xff] %vm1793_vm5, %v1788_v10 }
 0x77c   : > { %v1790_v11 = vpop.permute.xlu0 %1789 }
 0x77d   : > { %1795 = vst.msk [vmem:[#allocation3 + $0x8] sm:$0xff] %vm1793_vm5, %v1790_v11 }
 0x780   : > { %v1796_v12 = vld [vmem:[#allocation3] sm:$0xff] }
 0x781   : > { %2656 = vmatprep.mubr.msk.f32.mxu0 %vm894_vm1, %v1796_v12 }
 0x784   : > { %v1797_v13 = vld [vmem:[#allocation3 + $0x8] sm:$0xff] }
 0x785   : > { %2657 = vmatmul.mubr.msk.f32.vlgmr.msra.gmra.mrb[8].mxu0 %vm894_vm1, %v1797_v13 }
 0x786   : > { %2716 = vmatpush3.bf16.msra.mxu0 %v2713_v39 }
 0x787   : > { %2718 = vmatprep.subr.bf16.mxu0 %v2717_v61 }
 0x78a   : > { %2720 = vmatpush3.bf16.msra.mxu0 %v2717_v61 }
 0x858   : > { %v2658_v15 = vpop.f32.mrb[8].mxu0 }
 0x859   : > { %v1887_v16 = vadd.f32 %v2658_v15, %v2515_v14  ;;  %v1881_v17 = vpop.f32.mrb[9].mxu0 }
 0x85a   : > { %v1882_v18 = vadd.f32 %v2515_v14, %v1881_v17 }
 0x85b   : > { %v1891_v19 = vadd.f32 %v1887_v16, %v3821_v55 }
 0x85c   : > { %v1890_v20 = vadd.f32 %v1882_v18, %v3817_v53 }
 0x85d   : > { %v1897_v21 = vsel %vm894_vm1, %v1891_v19, 0.0 }
 0x85e   : > { %1898 = vadd.xlane.f32.xlu0 %v1897_v21  ;;  %v1894_v22 = vsel %vm894_vm1, %v1890_v20, 0.0 }
 0x85f   : > { %1895 = vadd.xlane.f32.xlu1 %v1894_v22 }
 0x870   : > { %2126 = vperm.xlu1 %2870, %v3750_v0   ;;  %v2523_v0 = vld [vmem:[%s860_s22] ss:$0 sm:$0xff] }
 0x8eb   : > { %v1899_v23 = vpop.xlane.xlu0 %1898 }
 0x8ec   : > { %v1901_v24 = vmul.f32 0.03125, %v1899_v23  ;;  %v1896_v25 = vpop.xlane.xlu1 %1895 }
 0x8ed   : > { %v1900_v26 = vmul.f32 0.03125, %v1896_v25 }
 0x8ee   : > { %v1903_v27 = vsub.f32 %v1891_v19, %v1901_v24 }
 0x8ef   : > { %v1902_v28 = vsub.f32 %v1890_v20, %v1900_v26 }
 0x8f0   : > { %v1905_v55 = vmul.f32 %v1903_v27, %v1903_v27  ;;  %v2127_v12 = vpop.permute.xlu1 %2126 }
 0x8f1   : > { %v1904_v29 = vmul.f32 %v1902_v28, %v1902_v28 }
 0x8f2   : > { %v1909_v30 = vsel %vm894_vm1, %v1905_v55, 0.0 }
 0x8f3   : > { %v1906_v53 = vsel %vm894_vm1, %v1904_v29, 0.0 }
 0x8f4   : > { %1907 = vadd.xlane.f32.xlu0 %v1906_v53 }
 0x8f8   : > { %1910 = vadd.xlane.f32.xlu0 %v1909_v30 }
 0x90e   : > { %2131 = vperm.xlu0 %2871, %v3752_v1  }
 0x981   : > { %v1908_v40 = vpop.xlane.xlu0 %1907 }
 0x982   : > { %v1912_v41 = vmul.f32 0.03125, %v1908_v40 }
 0x984   : > { %v1914_v42 = vadd.f32 1e-08, %v1912_v41 }
 0x985   : > { %v1911_v43 = vpop.xlane.xlu0 %1910 }
 0x986   : > { %2892 = vrsqrt.f32 %v1914_v42  ;;  %v1913_v44 = vmul.f32 0.03125, %v1911_v43 }
 0x988   : > { %v1915_v45 = vadd.f32 1e-08, %v1913_v44 }
 0x98a   : > { %2894 = vrsqrt.f32 %v1915_v45 }
 0x98d   : > { %v2132_v10 = vpop.permute.xlu0 %2131 }
 0x990   : > { %v2893_v46 = vpop.eup %2892 }
 0x991   : > { %v1918_v48 = vmul.f32 %v2893_v46, %v1902_v28 }
 0x993   : > { %v1926_v50 = vmul.f32 %v2518_v47, %v1918_v48 }
 0x994   : > { %v2895_v51 = vpop.eup %2894 }
 0x995   : > { %v1919_v52 = vmul.f32 %v2895_v51, %v1903_v27  ;;  %v1934_v54 = vadd.f32 %v2519_v49, %v1926_v50 }
 0x997   : > { %v1927_v57 = vmul.f32 %v2518_v47, %v1919_v52  ;;  %2667 = vmatprep.mubr.msk.f32.mxu1 %vm894_vm1, %v1934_v54 }
 0x999   : > { %v1935_v58 = vadd.f32 %v2519_v49, %v1927_v57 }
 0x99b   : > { %2668 = vmatmul.mubr.msk.f32.vlgmr.msra.gmra.mrb[12].mxu1 %vm894_vm1, %v1935_v58 }
 0xa6e   : > { %v2669_v2 = vpop.f32.mrb[12].mxu1 }
 0xa6f   : > { %v2025_v3 = vadd.f32 %v2669_v2, %v2520_v63  ;;  %v2019_v4 = vpop.f32.mrb[13].mxu1 }
 0xa70   : > { %v2020_v56 = vadd.f32 %v2520_v63, %v2019_v4 }
 0xa71   : > { %v2029_v6 = vmax.f32 %v2025_v3, 0.0 }
 0xa72   : > { %v2028_v5 = vmax.f32 %v2020_v56, 0.0 }
 0xa74   : > { %2678 = vmatprep.mubr.msk.f32.mxu0 %vm894_vm1, %v2028_v5 }
 0xa75   : > { %2679 = vmatmul.mubr.msk.f32.vlgmr.msra.gmra.mrb[10].mxu0 %vm894_vm1, %v2029_v6 }
 0xb48   : > { %v2680_v1 = vpop.f32.mrb[10].mxu0 }
 0xb49   : > { %v2119_v7 = vadd.f32 %v2680_v1, %v2523_v0  ;;  %v2113_v8 = vpop.f32.mrb[11].mxu0 }
 0xb4a   : > { %v2114_v9 = vadd.f32 %v2523_v0, %v2113_v8  ;;  %2141 = sbr.rel (%p2526_p6) target bundleno = 3214 (0xc8e), region = 116 }
 0xb4b   : > { %v2123_v11 = vadd.f32 %v2119_v7, %v1935_v58 }
 0xb4c   : > { %v2122_v13 = vadd.f32 %v2114_v9, %v1934_v54 }
 0xb4d   : > { %v2135_v14 = vmul.f32 %v2132_v10, %v2123_v11 }
 0xb4e   : > { %v2134_v15 = vmul.f32 %v2127_v12, %v2122_v13 }
 0xb4f   : > { %2137 = vst.msk [vmem:[#allocation2 + $0x8] sm:$0xff] %vm894_vm1, %v2135_v14  ;;  %v2147_v17 = vsel (!%p2526_p6), %vm894_vm1, %v2135_v14, 0.0 }
 0xb50   : > { %2136 = vst.msk [vmem:[#allocation2] sm:$0xff] %vm894_vm1, %v2134_v15  ;;  %v2144_v16 = vsel (!%p2526_p6), %vm894_vm1, %v2134_v15, 0.0 }
 0xb51   : > { %2145 = vadd.xlane.f32.xlu0 %v2144_v16 }
 0xb55   : > { %2148 = vadd.xlane.f32.xlu0 %v2147_v17 }
 0xbde   : > { %v2146_v18 = vpop.xlane.xlu0 %2145 }
 0xbdf   : > { %v2150_v19 = vmul.f32 0.03125, %v2146_v18 }
 0xbe1   : > { %v2152_v20 = vsub.f32 %v2134_v15, %v2150_v19 }
 0xbe2   : > { %v2149_v21 = vpop.xlane.xlu0 %2148 }
 0xbe3   : > { %v2151_v22 = vmul.f32 0.03125, %v2149_v21  ;;  %v2154_v23 = vmul.f32 %v2152_v20, %v2152_v20 }
 0xbe5   : > { %v2153_v24 = vsub.f32 %v2135_v14, %v2151_v22  ;;  %v2156_v25 = vsel %vm894_vm1, %v2154_v23, 0.0 }
 0xbe6   : > { %2157 = vadd.xlane.f32.xlu1 %v2156_v25 }
 0xbe7   : > { %v2155_v26 = vmul.f32 %v2153_v24, %v2153_v24 }
 0xbe9   : > { %v2159_v27 = vsel %vm894_vm1, %v2155_v26, 0.0 }
 0xbea   : > { %2160 = vadd.xlane.f32.xlu1 %v2159_v27 }
 0xc73   : > { %v2158_v28 = vpop.xlane.xlu1 %2157 }
 0xc74   : > { %v2162_v29 = vmul.f32 0.03125, %v2158_v28 }
 0xc76   : > { %v2164_v53 = vadd.f32 1e-08, %v2162_v29 }
 0xc77   : > { %v2161_v55 = vpop.xlane.xlu1 %2160 }
 0xc78   : > { %2896 = vrsqrt.f32 %v2164_v53  ;;  %v2163_v30 = vmul.f32 0.03125, %v2161_v55 }
 0xc7a   : > { %v2165_v31 = vadd.f32 1e-08, %v2163_v30 }
 0xc7c   : > { %2898 = vrsqrt.f32 %v2165_v31 }
 0xc82   : > { %v2897_v32 = vpop.eup %2896 }
 0xc83   : > { %v2168_v34 = vmul.f32 %v2897_v32, %v2152_v20 }
 0xc85   : > { %v2176_v36 = vmul.f32 %v2527_v33, %v2168_v34 }
 0xc86   : > { %v2899_v37 = vpop.eup %2898 }
 0xc87   : > { %v2184_v38 = vadd.f32 %v2528_v35, %v2176_v36  ;;  %v2169_v39 = vmul.f32 %v2899_v37, %v2153_v24 }
 0xc89   : > { %2186 = vst.msk [vmem:[%s3782_s9] sm:$0xff] %vm894_vm1, %v2184_v38  ;;  %v2177_v40 = vmul.f32 %v2527_v33, %v2169_v39 }
 0xc8b   : > { %v2185_v41 = vadd.f32 %v2528_v35, %v2177_v40 }
 0xc8d   : > { %2187 = vst.msk [vmem:[%s3782_s9 + $0x8] sm:$0xff] %vm894_vm1, %v2185_v41 }
 0xc8e PF: > { %s4152_s29 = sld [smem:[#allocation27_spill]]  ;;  %s4153_s16 = sld [smem:[#allocation53_spill]] }
 0xc8f   : > { %s2202_s5 = sshll.u32 %s3782_s9, 4  ;;  %s2189_s27 = scalar_lea.sflag [#allocation6], %s3700_s19  ;;  %s3949_s5 = int_to_ptr.vmem [resolvable:$true] %s2202_s5 }
 0xc90   : > { %s3080_s10 = scalar_lea.vmem %s3949_s5, 256  ;;  %p4154_p1 = scmp.ne.s32.totalorder %s4109_s4, 0 }
 0xc91   : > { %p3081_p2 = scmp.ne.s32.totalorder %s3949_s5, %s3080_s10  ;;  %s3231_s18 = smov [#allocation15]  }
 0xc92   : > { %s3084_s8 = sshll.u32 %s3231_s18, 4  ;;  %s3085_s8 = int_to_ptr.vmem [resolvable:$false] %s3084_s8 }
 0xc93   : > { %p3082_p9 = pnand %p3081_p2, %p4154_p1  ;;  %s3086_s28 = scalar_lea.vmem %s3085_s8, 512 }
 0xc94   : > { %s2539_s3 = sshll.u32 %s4152_s29, 8  ;;  %p3087_p3 = scmp.lt.s32.totalorder %s3949_s5, %s3085_s8 }
 0xc95   : > { %s3946_s14 = scalar_lea.hbm %s4153_s16, %s2539_s3  ;;  %p3083_p13 = pneg %p3082_p9 }
 0xc96   : > { %p3088_p0 = scmp.lt.s32.totalorder %s3086_s28, %s3080_s10 }
 0xc98   : > { %p3089_p4 = por %p3088_p0, %p3087_p3 }
 0xc9a   : > { %p3090_p11 = pnand %p3089_p4, %p3083_p13 }
 0xc9c   : > { %3093 = shalt.err (!%p3090_p11)
}
 0xc9d   : > { %s3094_s9 = scalar_lea.hbm %s3946_s14, 256  ;;  %s3098_s26 = scalar_lea.hbm %s4153_s16, 512 }
 0xc9e   : > { %p3095_p8 = scmp.ne.s32.totalorder %s3946_s14, %s3094_s9  ;;  %p3099_p7 = scmp.lt.u32.totalorder %s3946_s14, %s4153_s16 }
 0xc9f   : > { %p3100_p5 = scmp.lt.u32.totalorder %s3098_s26, %s3094_s9  ;;  %p3102_p2 = scmp.lt.u32.totalorder %s3094_s9, %s3946_s14 }
 0xca0   : > { %p3096_p10 = pnand %p3095_p8, %p4154_p1 }
 0xca1   : > { %p3101_p6 = por %p3100_p5, %p3099_p7 }
 0xca2   : > { %p3097_p12 = pneg %p3096_p10 }
 0xca3   : > { %p3103_p9 = por %p3102_p2, %p3101_p6 }
 0xca5   : > { %p3104_p13 = pnand %p3103_p9, %p3097_p12 }
 0xca7   : > { %3107 = shalt.err (!%p3104_p13)
}
 0xca8   : > { %s3232_s17 = smov 128   ;;  %s3233_s6 = smov 8  }
 0xca9   : > { %2733 = dma.vmem_to_hbm [thread:$0]  (%p4154_p1), %s3949_s5, 256, %s3946_s14, %s2189_s27, %s3232_s17, %s3232_s17, %s3233_s6  }
 0xcaa PF: > { %s4155_s25 = sld [smem:[#allocation23_spill]]  ;;  %s4156_s24 = sld [smem:[#allocation36_spill]] }
 0xcab   : > { %p2759_p3 = scmp.ge.s32.totalorder %s3214_s0, 2 }
 0xcb0   : > { %s2217_s22 = sand.u32 1, %s4155_s25   ;;  %p4157_p0 = scmp.ne.s32.totalorder %s4156_s24, 0 }
 0xcb1   : > { %s2218_s21 = scalar_lea.sflag [#allocation6], %s2217_s22 }
 0xcb2   : > { %p2755_p4 = pnand %p2759_p3, %p4157_p0 }
 0xcb4   : > { %3169 = dma.done.wait (!%p2755_p4), %s2218_s21, 256  }
 0xcb5   : > { %3171 = vsyncadd (!%p2755_p4), %s2218_s21, 4294967040  ;;  %s41_s0 = sadd.s32 1, %s3214_s0   ;;  %s4158_s21 = sld [smem:[#allocation21_spill]] }
 0xcb6   : > { %p38_p11 = scmp.ge.s32.totalorder %s41_s0, 6   ;;  %s4159_s22 = sld [smem:[#allocation22_spill]] }
 0xcb7   : > { %s4160_s23 = sld [smem:[#allocation31_spill]]  ;;  %s4161_s24 = sld [smem:[#allocation24_spill]] }
 0xcb8   : > { %s4162_s25 = sld [smem:[#allocation25_spill]]  ;;  %s4163_s26 = sld [smem:[#allocation35_spill]] }
 0xcb9   : > { %s4164_s27 = sld [smem:[#allocation28_spill]]  ;;  %s4165_s28 = sld [smem:[#allocation29_spill]] }
 0xcba   : > { %s4166_s29 = sld [smem:[#allocation30_spill]]  ;;  %s4167_s30 = sld [smem:[#allocation33_spill]] }
 0xcbb   :  { %40 = sbr.rel (!%p38_p11) target bundleno = 33 (0x21), region = 222 }
 0xcc2   :  { %2223 = vsyncpa [#allocation5], 1 }
 0xcc3   :  { %2225 = vsyncpa [#allocation5 + $0x1], 1 }
 0xcc4   :  { %2226 = vsyncpa [#allocation8], 1 }
 0xcc5   :  { %2228 = vsyncpa [#allocation8 + $0x1], 1 }
 0xcc6   :  { %2229 = vsyncpa [#allocation11], 1 }
 0xcc7   :  { %2231 = vsyncpa [#allocation11 + $0x1], 1 }
 0xcc8   :  { %2232 = vsyncpa [#allocation14], 1 }
 0xcc9   :  { %2234 = vsyncpa [#allocation14 + $0x1], 1 }
 0xcca   :  { %2235 = vsyncpa [#allocation6], 1 }
 0xccb   :  { %2237 = vsyncpa [#allocation6 + $0x1], 1 }

</bundles_post_ra>
